<compile_context>
chip_gen: v6e
topology: v6e:2x2x1
jax: 0.10.0
libtpu: 0.0.40
codegen_flags: <defaults>
</compile_context>

<pallas_src>
import math

import jax
import jax.numpy as jnp
from jax.experimental import pallas as pl
from jax.experimental.pallas import tpu as pltpu  # noqa: F401  (kept for completeness)

# ---- synthetic encoder config (small shapes) ----
VOCAB = 100
HIDDEN = 32
N_LAYERS = 2
N_HEADS = 4
HEAD_DIM = HIDDEN // N_HEADS
FFN = 64
MAX_POS = 16
N_CLASSES = 2
LN_EPS = 1e-12
LANE = 128  # lane-dense classifier output width


# ---------------- fused Pallas kernel ----------------

def _layernorm(x, g, b):
    mu = jnp.mean(x, axis=-1, keepdims=True)
    var = jnp.mean(jnp.square(x - mu), axis=-1, keepdims=True)
    return (x - mu) * jax.lax.rsqrt(var + LN_EPS) * g + b


def _make_kernel(batch, seq_len):
    scale = 1.0 / math.sqrt(HEAD_DIM)
    bf16 = jnp.bfloat16

    def kernel(x_ref, bias_ref, eg_ref, eb_ref,
               qkvw_ref, qkvb_ref, aow_ref, aob_ref,
               ln1g_ref, ln1b_ref, ff1w_ref, ff1b_ref,
               ff2w_ref, ff2b_ref, ln2g_ref, ln2b_ref,
               clsw_ref, clsb_ref, o_ref):
        x = x_ref[...]                                   # [B*S, H] f32 (whole batch slab)
        bias = bias_ref[...]                             # [B*S, B*S] block-diag + key-pad mask
        x = _layernorm(x, eg_ref[...], eb_ref[...])

        for l in range(N_LAYERS):
            # ---- fused QKV projection: one matmul per layer ----
            qkv = jnp.dot(x.astype(bf16), qkvw_ref[l],
                          preferred_element_type=jnp.float32) + qkvb_ref[l]   # [BS, 3H]

            # ---- per-head attention from static lane slices ----
            ctxs = []
            for h in range(N_HEADS):
                q = qkv[:, h * HEAD_DIM:(h + 1) * HEAD_DIM]
                k = qkv[:, HIDDEN + h * HEAD_DIM: HIDDEN + (h + 1) * HEAD_DIM]
                v = qkv[:, 2 * HIDDEN + h * HEAD_DIM: 2 * HIDDEN + (h + 1) * HEAD_DIM]
                # s[i, j] = sum_d q[i, d] * k[j, d]   (q @ k.T without explicit transpose)
                s = jax.lax.dot_general(q.astype(bf16), k.astype(bf16),
                                        (((1,), (1,)), ((), ())),
                                        preferred_element_type=jnp.float32) * scale
                s = s + bias
                s = s - jnp.max(s, axis=-1, keepdims=True)
                p = jnp.exp(s)
                p = p * pl.reciprocal(jnp.sum(p, axis=-1, keepdims=True), approx=True)
                ctxs.append(jnp.dot(p.astype(bf16), v.astype(bf16),
                                    preferred_element_type=jnp.float32))       # [BS, Dh]

            # ---- fused attention output projection (single matmul) ----
            ctx = jnp.concatenate(ctxs, axis=-1)                               # [BS, H]
            attn = jnp.dot(ctx.astype(bf16), aow_ref[l],
                           preferred_element_type=jnp.float32) + aob_ref[l]
            x = _layernorm(x + attn, ln1g_ref[l], ln1b_ref[l])

            # ---- feed-forward ----
            ff = jnp.dot(x.astype(bf16), ff1w_ref[l],
                         preferred_element_type=jnp.float32) + ff1b_ref[l]
            # TODO(synk): HF BERT uses exact (erf) GELU; tanh approximation used here.
            ff = jax.nn.gelu(ff, approximate=True)
            ff = jnp.dot(ff.astype(bf16), ff2w_ref[l],
                         preferred_element_type=jnp.float32) + ff2b_ref[l]
            x = _layernorm(x + ff, ln2g_ref[l], ln2b_ref[l])

        # ---- CLS pooling for all sequences + classifier head in one matmul/store ----
        # (dropout = identity at inference)
        cls = jnp.concatenate(
            [x[b * seq_len: b * seq_len + 1, :] for b in range(batch)], axis=0)  # [B, H]
        logits = jnp.dot(cls.astype(bf16), clsw_ref[...],
                         preferred_element_type=jnp.float32) + clsb_ref[...]      # [B, 128]
        o_ref[...] = logits.astype(o_ref.dtype)

    return kernel


# ---------------- parameters (deterministic init, packed per-layer layout) ----------------

def init_params(key):
    def normal(k, shape, scale=0.02):
        return (scale * jax.random.normal(k, shape)).astype(jnp.float32)

    L, H, F = N_LAYERS, HIDDEN, FFN
    ks = jax.random.split(key, 7)
    return {
        'tok_emb': normal(ks[0], (VOCAB, H)),
        'pos_emb': normal(ks[1], (MAX_POS, H)),
        'emb_ln_g': jnp.ones((1, H), jnp.float32),
        'emb_ln_b': jnp.zeros((1, H), jnp.float32),
        # packed [q_h0..q_h3 | k_h0..k_h3 | v_h0..v_h3] along output lanes
        'qkv_w': normal(ks[2], (L, H, 3 * H)),
        'qkv_b': jnp.zeros((L, 1, 3 * H), jnp.float32),
        # rows ordered head0..head3 to match the kernel's ctx lane concat order
        'ao_w': normal(ks[3], (L, H, H)),
        'ao_b': jnp.zeros((L, 1, H), jnp.float32),
        'ln1_g': jnp.ones((L, 1, H), jnp.float32),
        'ln1_b': jnp.zeros((L, 1, H), jnp.float32),
        'ff1_w': normal(ks[4], (L, H, F)),
        'ff1_b': jnp.zeros((L, 1, F), jnp.float32),
        'ff2_w': normal(ks[5], (L, F, H)),
        'ff2_b': jnp.zeros((L, 1, H), jnp.float32),
        'ln2_g': jnp.ones((L, 1, H), jnp.float32),
        'ln2_b': jnp.zeros((L, 1, H), jnp.float32),
        'cls_w': normal(ks[6], (H, N_CLASSES)),   # nn.Linear(hidden, 2)
        'cls_b': jnp.zeros((N_CLASSES,), jnp.float32),
    }


# ---------------- forward (CrossEncoder.forward) ----------------

def cross_encoder_forward(params, input_ids, attention_mask):
    B, S = input_ids.shape
    BS = B * S

    # embeddings (gather is glue, not the hot path)
    x = jnp.take(params['tok_emb'], input_ids, axis=0) + params['pos_emb'][None, :S, :]
    x2d = x.reshape(BS, HIDDEN).astype(jnp.float32)

    # block-diagonal additive mask, built once in the wrapper:
    # query row b*S+i may attend key col c*S+j only if c == b and attention_mask[c, j] == 1
    m = attention_mask.astype(jnp.float32)                                   # [B, S]
    allowed = jnp.eye(B, dtype=jnp.float32)[:, :, None] * m[None, :, :]      # [B, B, S]
    allowed = jnp.broadcast_to(allowed[:, None, :, :], (B, S, B, S)).reshape(BS, BS)
    bias = (1.0 - allowed) * (-1e9)

    # lane-pad the classifier to a 128-wide (lane-dense) output; slice back after the call
    cls_w = jnp.zeros((HIDDEN, LANE), jnp.float32).at[:, :N_CLASSES].set(params['cls_w'])
    cls_b = jnp.zeros((1, LANE), jnp.float32).at[0, :N_CLASSES].set(params['cls_b'])

    bf = jnp.bfloat16
    weight_args = (
        params['emb_ln_g'], params['emb_ln_b'],
        params['qkv_w'].astype(bf), params['qkv_b'],
        params['ao_w'].astype(bf), params['ao_b'],
        params['ln1_g'], params['ln1_b'],
        params['ff1_w'].astype(bf), params['ff1_b'],
        params['ff2_w'].astype(bf), params['ff2_b'],
        params['ln2_g'], params['ln2_b'],
        cls_w.astype(bf), cls_b,
    )

    # Single invocation (no grid): entire batch slab + all weights resident in VMEM,
    # no per-step pipeline overhead, no dead double-buffers.
    out = pl.pallas_call(
        _make_kernel(B, S),
        out_shape=jax.ShapeDtypeStruct((B, LANE), jnp.float32),
    )(x2d, bias, *weight_args)

    return out[:, :N_CLASSES]


if __name__ == "__main__":
    key = jax.random.PRNGKey(0)
    pkey, ikey = jax.random.split(key)
    params = init_params(pkey)

    B, S = 2, 8
    input_ids = jax.random.randint(ikey, (B, S), 0, VOCAB, dtype=jnp.int32)
    attention_mask = jnp.ones((B, S), jnp.int32).at[1, 6:].set(0)  # pad tail of row 1

    logits = cross_encoder_forward(params, input_ids, attention_mask)
    jax.block_until_ready(logits)
    assert logits.shape == (B, N_CLASSES) and logits.dtype == jnp.float32
    assert bool(jnp.all(jnp.isfinite(logits)))
    print("KERNEL_OK")
</pallas_src>

<mosaic_0001>
module attributes {stable_mosaic.version = 11 : i64} {
  func.func @kernel(%arg0: memref<16x32xf32, #tpu.memory_space<vmem>>, %arg1: memref<16x16xf32, #tpu.memory_space<vmem>>, %arg2: memref<1x32xf32, #tpu.memory_space<vmem>>, %arg3: memref<1x32xf32, #tpu.memory_space<vmem>>, %arg4: memref<2x32x96xbf16, #tpu.memory_space<vmem>>, %arg5: memref<2x1x96xf32, #tpu.memory_space<vmem>>, %arg6: memref<2x32x32xbf16, #tpu.memory_space<vmem>>, %arg7: memref<2x1x32xf32, #tpu.memory_space<vmem>>, %arg8: memref<2x1x32xf32, #tpu.memory_space<vmem>>, %arg9: memref<2x1x32xf32, #tpu.memory_space<vmem>>, %arg10: memref<2x32x64xbf16, #tpu.memory_space<vmem>>, %arg11: memref<2x1x64xf32, #tpu.memory_space<vmem>>, %arg12: memref<2x64x32xbf16, #tpu.memory_space<vmem>>, %arg13: memref<2x1x32xf32, #tpu.memory_space<vmem>>, %arg14: memref<2x1x32xf32, #tpu.memory_space<vmem>>, %arg15: memref<2x1x32xf32, #tpu.memory_space<vmem>>, %arg16: memref<32x128xbf16, #tpu.memory_space<vmem>>, %arg17: memref<1x128xf32, #tpu.memory_space<vmem>>, %arg18: memref<2x128xf32, #tpu.memory_space<vmem>>) attributes {dimension_semantics = [], scalar_prefetch = 0 : i64, scratch_operands = 0 : i64, tpu.core_type = #tpu.core_type<tc>} {
    %c0 = arith.constant 0 : index
    %c0_0 = arith.constant 0 : index
    %0 = vector.load %arg0[%c0, %c0_0] : memref<16x32xf32, #tpu.memory_space<vmem>>, vector<16x32xf32>
    %c0_1 = arith.constant 0 : index
    %c0_2 = arith.constant 0 : index
    %1 = vector.load %arg1[%c0_1, %c0_2] : memref<16x16xf32, #tpu.memory_space<vmem>>, vector<16x16xf32>
    %c0_3 = arith.constant 0 : index
    %c0_4 = arith.constant 0 : index
    %2 = vector.load %arg2[%c0_3, %c0_4] : memref<1x32xf32, #tpu.memory_space<vmem>>, vector<1x32xf32>
    %c0_5 = arith.constant 0 : index
    %c0_6 = arith.constant 0 : index
    %3 = vector.load %arg3[%c0_5, %c0_6] : memref<1x32xf32, #tpu.memory_space<vmem>>, vector<1x32xf32>
    %cst = arith.constant dense<0.000000e+00> : vector<16xf32>
    %4 = vector.multi_reduction <add>, %0, %cst [1] : vector<16x32xf32> to vector<16xf32>
    %5 = vector.shape_cast %4 : vector<16xf32> to vector<16x1xf32>
    %cst_7 = arith.constant 3.200000e+01 : f32
    %6 = vector.broadcast %cst_7 : f32 to vector<16x1xf32>
    %7 = arith.divf %5, %6 : vector<16x1xf32>
    %8 = vector.broadcast %7 : vector<16x1xf32> to vector<16x32xf32>
    %9 = arith.subf %0, %8 : vector<16x32xf32>
    %10 = arith.mulf %9, %9 : vector<16x32xf32>
    %cst_8 = arith.constant dense<0.000000e+00> : vector<16xf32>
    %11 = vector.multi_reduction <add>, %10, %cst_8 [1] : vector<16x32xf32> to vector<16xf32>
    %12 = vector.shape_cast %11 : vector<16xf32> to vector<16x1xf32>
    %cst_9 = arith.constant 3.200000e+01 : f32
    %13 = vector.broadcast %cst_9 : f32 to vector<16x1xf32>
    %14 = arith.divf %12, %13 : vector<16x1xf32>
    %15 = vector.broadcast %7 : vector<16x1xf32> to vector<16x32xf32>
    %16 = arith.subf %0, %15 : vector<16x32xf32>
    %cst_10 = arith.constant 9.99999996E-13 : f32
    %17 = vector.broadcast %cst_10 : f32 to vector<16x1xf32>
    %18 = arith.addf %14, %17 : vector<16x1xf32>
    %19 = math.rsqrt %18 : vector<16x1xf32>
    %20 = vector.broadcast %19 : vector<16x1xf32> to vector<16x32xf32>
    %21 = arith.mulf %16, %20 : vector<16x32xf32>
    %22 = vector.broadcast %2 : vector<1x32xf32> to vector<16x32xf32>
    %23 = arith.mulf %21, %22 : vector<16x32xf32>
    %24 = vector.broadcast %3 : vector<1x32xf32> to vector<16x32xf32>
    %25 = arith.addf %23, %24 : vector<16x32xf32>
    %26 = arith.truncf %25 : vector<16x32xf32> to vector<16x32xbf16>
    %c0_11 = arith.constant 0 : index
    %c0_12 = arith.constant 0 : index
    %c0_13 = arith.constant 0 : index
    %27 = vector.load %arg4[%c0_11, %c0_12, %c0_13] : memref<2x32x96xbf16, #tpu.memory_space<vmem>>, vector<1x32x96xbf16>
    %28 = vector.shape_cast %27 : vector<1x32x96xbf16> to vector<32x96xbf16>
    %cst_14 = arith.constant dense<0.000000e+00> : vector<16x96xf32>
    %29 = tpu.matmul %26, %28, %cst_14 {dimension_numbers = #tpu.dot_dimension_numbers<[1], [0], [0], [1], [0, 0, 1, 1], [], []>} : vector<16x32xbf16>, vector<32x96xbf16>, vector<16x96xf32> -> vector<16x96xf32>
    %c0_15 = arith.constant 0 : index
    %c0_16 = arith.constant 0 : index
    %c0_17 = arith.constant 0 : index
    %30 = vector.load %arg5[%c0_15, %c0_16, %c0_17] : memref<2x1x96xf32, #tpu.memory_space<vmem>>, vector<1x1x96xf32>
    %31 = vector.shape_cast %30 : vector<1x1x96xf32> to vector<1x96xf32>
    %32 = vector.broadcast %31 : vector<1x96xf32> to vector<16x96xf32>
    %33 = arith.addf %29, %32 : vector<16x96xf32>
    %34 = vector.extract_strided_slice %33 {offsets = [0, 0], sizes = [16, 8], strides = [1, 1]} : vector<16x96xf32> to vector<16x8xf32>
    %35 = vector.extract_strided_slice %33 {offsets = [0, 32], sizes = [16, 8], strides = [1, 1]} : vector<16x96xf32> to vector<16x8xf32>
    %36 = vector.extract_strided_slice %33 {offsets = [0, 64], sizes = [16, 8], strides = [1, 1]} : vector<16x96xf32> to vector<16x8xf32>
    %37 = arith.truncf %34 : vector<16x8xf32> to vector<16x8xbf16>
    %38 = arith.truncf %35 : vector<16x8xf32> to vector<16x8xbf16>
    %cst_18 = arith.constant dense<0.000000e+00> : vector<16x16xf32>
    %39 = tpu.matmul %37, %38, %cst_18 {dimension_numbers = #tpu.dot_dimension_numbers<[1], [1], [0], [0], [0, 0, 1, 0], [], []>} : vector<16x8xbf16>, vector<16x8xbf16>, vector<16x16xf32> -> vector<16x16xf32>
    %cst_19 = arith.constant 0.353553385 : f32
    %40 = vector.broadcast %cst_19 : f32 to vector<16x16xf32>
    %41 = arith.mulf %39, %40 : vector<16x16xf32>
    %42 = arith.addf %41, %1 : vector<16x16xf32>
    %cst_20 = arith.constant dense<0xFF800000> : vector<16xf32>
    %43 = vector.multi_reduction <maximumf>, %42, %cst_20 [1] : vector<16x16xf32> to vector<16xf32>
    %44 = vector.shape_cast %43 : vector<16xf32> to vector<16x1xf32>
    %45 = vector.broadcast %44 : vector<16x1xf32> to vector<16x16xf32>
    %46 = arith.subf %42, %45 : vector<16x16xf32>
    %47 = math.exp %46 : vector<16x16xf32>
    %cst_21 = arith.constant dense<0.000000e+00> : vector<16xf32>
    %48 = vector.multi_reduction <add>, %47, %cst_21 [1] : vector<16x16xf32> to vector<16xf32>
    %49 = vector.shape_cast %48 : vector<16xf32> to vector<16x1xf32>
    %50 = tpu.reciprocal %49 {approx = true} : vector<16x1xf32> -> vector<16x1xf32>
    %51 = vector.broadcast %50 : vector<16x1xf32> to vector<16x16xf32>
    %52 = arith.mulf %47, %51 : vector<16x16xf32>
    %53 = arith.truncf %52 : vector<16x16xf32> to vector<16x16xbf16>
    %54 = arith.truncf %36 : vector<16x8xf32> to vector<16x8xbf16>
    %cst_22 = arith.constant dense<0.000000e+00> : vector<16x8xf32>
    %55 = tpu.matmul %53, %54, %cst_22 {dimension_numbers = #tpu.dot_dimension_numbers<[1], [0], [0], [1], [0, 0, 1, 1], [], []>} : vector<16x16xbf16>, vector<16x8xbf16>, vector<16x8xf32> -> vector<16x8xf32>
    %56 = vector.extract_strided_slice %33 {offsets = [0, 8], sizes = [16, 8], strides = [1, 1]} : vector<16x96xf32> to vector<16x8xf32>
    %57 = vector.extract_strided_slice %33 {offsets = [0, 40], sizes = [16, 8], strides = [1, 1]} : vector<16x96xf32> to vector<16x8xf32>
    %58 = vector.extract_strided_slice %33 {offsets = [0, 72], sizes = [16, 8], strides = [1, 1]} : vector<16x96xf32> to vector<16x8xf32>
    %59 = arith.truncf %56 : vector<16x8xf32> to vector<16x8xbf16>
    %60 = arith.truncf %57 : vector<16x8xf32> to vector<16x8xbf16>
    %cst_23 = arith.constant dense<0.000000e+00> : vector<16x16xf32>
    %61 = tpu.matmul %59, %60, %cst_23 {dimension_numbers = #tpu.dot_dimension_numbers<[1], [1], [0], [0], [0, 0, 1, 0], [], []>} : vector<16x8xbf16>, vector<16x8xbf16>, vector<16x16xf32> -> vector<16x16xf32>
    %cst_24 = arith.constant 0.353553385 : f32
    %62 = vector.broadcast %cst_24 : f32 to vector<16x16xf32>
    %63 = arith.mulf %61, %62 : vector<16x16xf32>
    %64 = arith.addf %63, %1 : vector<16x16xf32>
    %cst_25 = arith.constant dense<0xFF800000> : vector<16xf32>
    %65 = vector.multi_reduction <maximumf>, %64, %cst_25 [1] : vector<16x16xf32> to vector<16xf32>
    %66 = vector.shape_cast %65 : vector<16xf32> to vector<16x1xf32>
    %67 = vector.broadcast %66 : vector<16x1xf32> to vector<16x16xf32>
    %68 = arith.subf %64, %67 : vector<16x16xf32>
    %69 = math.exp %68 : vector<16x16xf32>
    %cst_26 = arith.constant dense<0.000000e+00> : vector<16xf32>
    %70 = vector.multi_reduction <add>, %69, %cst_26 [1] : vector<16x16xf32> to vector<16xf32>
    %71 = vector.shape_cast %70 : vector<16xf32> to vector<16x1xf32>
    %72 = tpu.reciprocal %71 {approx = true} : vector<16x1xf32> -> vector<16x1xf32>
    %73 = vector.broadcast %72 : vector<16x1xf32> to vector<16x16xf32>
    %74 = arith.mulf %69, %73 : vector<16x16xf32>
    %75 = arith.truncf %74 : vector<16x16xf32> to vector<16x16xbf16>
    %76 = arith.truncf %58 : vector<16x8xf32> to vector<16x8xbf16>
    %cst_27 = arith.constant dense<0.000000e+00> : vector<16x8xf32>
    %77 = tpu.matmul %75, %76, %cst_27 {dimension_numbers = #tpu.dot_dimension_numbers<[1], [0], [0], [1], [0, 0, 1, 1], [], []>} : vector<16x16xbf16>, vector<16x8xbf16>, vector<16x8xf32> -> vector<16x8xf32>
    %78 = vector.extract_strided_slice %33 {offsets = [0, 16], sizes = [16, 8], strides = [1, 1]} : vector<16x96xf32> to vector<16x8xf32>
    %79 = vector.extract_strided_slice %33 {offsets = [0, 48], sizes = [16, 8], strides = [1, 1]} : vector<16x96xf32> to vector<16x8xf32>
    %80 = vector.extract_strided_slice %33 {offsets = [0, 80], sizes = [16, 8], strides = [1, 1]} : vector<16x96xf32> to vector<16x8xf32>
    %81 = arith.truncf %78 : vector<16x8xf32> to vector<16x8xbf16>
    %82 = arith.truncf %79 : vector<16x8xf32> to vector<16x8xbf16>
    %cst_28 = arith.constant dense<0.000000e+00> : vector<16x16xf32>
    %83 = tpu.matmul %81, %82, %cst_28 {dimension_numbers = #tpu.dot_dimension_numbers<[1], [1], [0], [0], [0, 0, 1, 0], [], []>} : vector<16x8xbf16>, vector<16x8xbf16>, vector<16x16xf32> -> vector<16x16xf32>
    %cst_29 = arith.constant 0.353553385 : f32
    %84 = vector.broadcast %cst_29 : f32 to vector<16x16xf32>
    %85 = arith.mulf %83, %84 : vector<16x16xf32>
    %86 = arith.addf %85, %1 : vector<16x16xf32>
    %cst_30 = arith.constant dense<0xFF800000> : vector<16xf32>
    %87 = vector.multi_reduction <maximumf>, %86, %cst_30 [1] : vector<16x16xf32> to vector<16xf32>
    %88 = vector.shape_cast %87 : vector<16xf32> to vector<16x1xf32>
    %89 = vector.broadcast %88 : vector<16x1xf32> to vector<16x16xf32>
    %90 = arith.subf %86, %89 : vector<16x16xf32>
    %91 = math.exp %90 : vector<16x16xf32>
    %cst_31 = arith.constant dense<0.000000e+00> : vector<16xf32>
    %92 = vector.multi_reduction <add>, %91, %cst_31 [1] : vector<16x16xf32> to vector<16xf32>
    %93 = vector.shape_cast %92 : vector<16xf32> to vector<16x1xf32>
    %94 = tpu.reciprocal %93 {approx = true} : vector<16x1xf32> -> vector<16x1xf32>
    %95 = vector.broadcast %94 : vector<16x1xf32> to vector<16x16xf32>
    %96 = arith.mulf %91, %95 : vector<16x16xf32>
    %97 = arith.truncf %96 : vector<16x16xf32> to vector<16x16xbf16>
    %98 = arith.truncf %80 : vector<16x8xf32> to vector<16x8xbf16>
    %cst_32 = arith.constant dense<0.000000e+00> : vector<16x8xf32>
    %99 = tpu.matmul %97, %98, %cst_32 {dimension_numbers = #tpu.dot_dimension_numbers<[1], [0], [0], [1], [0, 0, 1, 1], [], []>} : vector<16x16xbf16>, vector<16x8xbf16>, vector<16x8xf32> -> vector<16x8xf32>
    %100 = vector.extract_strided_slice %33 {offsets = [0, 24], sizes = [16, 8], strides = [1, 1]} : vector<16x96xf32> to vector<16x8xf32>
    %101 = vector.extract_strided_slice %33 {offsets = [0, 56], sizes = [16, 8], strides = [1, 1]} : vector<16x96xf32> to vector<16x8xf32>
    %102 = vector.extract_strided_slice %33 {offsets = [0, 88], sizes = [16, 8], strides = [1, 1]} : vector<16x96xf32> to vector<16x8xf32>
    %103 = arith.truncf %100 : vector<16x8xf32> to vector<16x8xbf16>
    %104 = arith.truncf %101 : vector<16x8xf32> to vector<16x8xbf16>
    %cst_33 = arith.constant dense<0.000000e+00> : vector<16x16xf32>
    %105 = tpu.matmul %103, %104, %cst_33 {dimension_numbers = #tpu.dot_dimension_numbers<[1], [1], [0], [0], [0, 0, 1, 0], [], []>} : vector<16x8xbf16>, vector<16x8xbf16>, vector<16x16xf32> -> vector<16x16xf32>
    %cst_34 = arith.constant 0.353553385 : f32
    %106 = vector.broadcast %cst_34 : f32 to vector<16x16xf32>
    %107 = arith.mulf %105, %106 : vector<16x16xf32>
    %108 = arith.addf %107, %1 : vector<16x16xf32>
    %cst_35 = arith.constant dense<0xFF800000> : vector<16xf32>
    %109 = vector.multi_reduction <maximumf>, %108, %cst_35 [1] : vector<16x16xf32> to vector<16xf32>
    %110 = vector.shape_cast %109 : vector<16xf32> to vector<16x1xf32>
    %111 = vector.broadcast %110 : vector<16x1xf32> to vector<16x16xf32>
    %112 = arith.subf %108, %111 : vector<16x16xf32>
    %113 = math.exp %112 : vector<16x16xf32>
    %cst_36 = arith.constant dense<0.000000e+00> : vector<16xf32>
    %114 = vector.multi_reduction <add>, %113, %cst_36 [1] : vector<16x16xf32> to vector<16xf32>
    %115 = vector.shape_cast %114 : vector<16xf32> to vector<16x1xf32>
    %116 = tpu.reciprocal %115 {approx = true} : vector<16x1xf32> -> vector<16x1xf32>
    %117 = vector.broadcast %116 : vector<16x1xf32> to vector<16x16xf32>
    %118 = arith.mulf %113, %117 : vector<16x16xf32>
    %119 = arith.truncf %118 : vector<16x16xf32> to vector<16x16xbf16>
    %120 = arith.truncf %102 : vector<16x8xf32> to vector<16x8xbf16>
    %cst_37 = arith.constant dense<0.000000e+00> : vector<16x8xf32>
    %121 = tpu.matmul %119, %120, %cst_37 {dimension_numbers = #tpu.dot_dimension_numbers<[1], [0], [0], [1], [0, 0, 1, 1], [], []>} : vector<16x16xbf16>, vector<16x8xbf16>, vector<16x8xf32> -> vector<16x8xf32>
    %122 = tpu.concatenate %55, %77, %99, %121 in 1 : vector<16x8xf32>, vector<16x8xf32>, vector<16x8xf32>, vector<16x8xf32> -> vector<16x32xf32>
    %123 = arith.truncf %122 : vector<16x32xf32> to vector<16x32xbf16>
    %c0_38 = arith.constant 0 : index
    %c0_39 = arith.constant 0 : index
    %c0_40 = arith.constant 0 : index
    %124 = vector.load %arg6[%c0_38, %c0_39, %c0_40] : memref<2x32x32xbf16, #tpu.memory_space<vmem>>, vector<1x32x32xbf16>
    %125 = vector.shape_cast %124 : vector<1x32x32xbf16> to vector<32x32xbf16>
    %cst_41 = arith.constant dense<0.000000e+00> : vector<16x32xf32>
    %126 = tpu.matmul %123, %125, %cst_41 {dimension_numbers = #tpu.dot_dimension_numbers<[1], [0], [0], [1], [0, 0, 1, 1], [], []>} : vector<16x32xbf16>, vector<32x32xbf16>, vector<16x32xf32> -> vector<16x32xf32>
    %c0_42 = arith.constant 0 : index
    %c0_43 = arith.constant 0 : index
    %c0_44 = arith.constant 0 : index
    %127 = vector.load %arg7[%c0_42, %c0_43, %c0_44] : memref<2x1x32xf32, #tpu.memory_space<vmem>>, vector<1x1x32xf32>
    %128 = vector.shape_cast %127 : vector<1x1x32xf32> to vector<1x32xf32>
    %129 = vector.broadcast %128 : vector<1x32xf32> to vector<16x32xf32>
    %130 = arith.addf %126, %129 : vector<16x32xf32>
    %131 = arith.addf %25, %130 : vector<16x32xf32>
    %c0_45 = arith.constant 0 : index
    %c0_46 = arith.constant 0 : index
    %c0_47 = arith.constant 0 : index
    %132 = vector.load %arg8[%c0_45, %c0_46, %c0_47] : memref<2x1x32xf32, #tpu.memory_space<vmem>>, vector<1x1x32xf32>
    %133 = vector.shape_cast %132 : vector<1x1x32xf32> to vector<1x32xf32>
    %c0_48 = arith.constant 0 : index
    %c0_49 = arith.constant 0 : index
    %c0_50 = arith.constant 0 : index
    %134 = vector.load %arg9[%c0_48, %c0_49, %c0_50] : memref<2x1x32xf32, #tpu.memory_space<vmem>>, vector<1x1x32xf32>
    %135 = vector.shape_cast %134 : vector<1x1x32xf32> to vector<1x32xf32>
    %cst_51 = arith.constant dense<0.000000e+00> : vector<16xf32>
    %136 = vector.multi_reduction <add>, %131, %cst_51 [1] : vector<16x32xf32> to vector<16xf32>
    %137 = vector.shape_cast %136 : vector<16xf32> to vector<16x1xf32>
    %cst_52 = arith.constant 3.200000e+01 : f32
    %138 = vector.broadcast %cst_52 : f32 to vector<16x1xf32>
    %139 = arith.divf %137, %138 : vector<16x1xf32>
    %140 = vector.broadcast %139 : vector<16x1xf32> to vector<16x32xf32>
    %141 = arith.subf %131, %140 : vector<16x32xf32>
    %142 = arith.mulf %141, %141 : vector<16x32xf32>
    %cst_53 = arith.constant dense<0.000000e+00> : vector<16xf32>
    %143 = vector.multi_reduction <add>, %142, %cst_53 [1] : vector<16x32xf32> to vector<16xf32>
    %144 = vector.shape_cast %143 : vector<16xf32> to vector<16x1xf32>
    %cst_54 = arith.constant 3.200000e+01 : f32
    %145 = vector.broadcast %cst_54 : f32 to vector<16x1xf32>
    %146 = arith.divf %144, %145 : vector<16x1xf32>
    %147 = vector.broadcast %139 : vector<16x1xf32> to vector<16x32xf32>
    %148 = arith.subf %131, %147 : vector<16x32xf32>
    %cst_55 = arith.constant 9.99999996E-13 : f32
    %149 = vector.broadcast %cst_55 : f32 to vector<16x1xf32>
    %150 = arith.addf %146, %149 : vector<16x1xf32>
    %151 = math.rsqrt %150 : vector<16x1xf32>
    %152 = vector.broadcast %151 : vector<16x1xf32> to vector<16x32xf32>
    %153 = arith.mulf %148, %152 : vector<16x32xf32>
    %154 = vector.broadcast %133 : vector<1x32xf32> to vector<16x32xf32>
    %155 = arith.mulf %153, %154 : vector<16x32xf32>
    %156 = vector.broadcast %135 : vector<1x32xf32> to vector<16x32xf32>
    %157 = arith.addf %155, %156 : vector<16x32xf32>
    %158 = arith.truncf %157 : vector<16x32xf32> to vector<16x32xbf16>
    %c0_56 = arith.constant 0 : index
    %c0_57 = arith.constant 0 : index
    %c0_58 = arith.constant 0 : index
    %159 = vector.load %arg10[%c0_56, %c0_57, %c0_58] : memref<2x32x64xbf16, #tpu.memory_space<vmem>>, vector<1x32x64xbf16>
    %160 = vector.shape_cast %159 : vector<1x32x64xbf16> to vector<32x64xbf16>
    %cst_59 = arith.constant dense<0.000000e+00> : vector<16x64xf32>
    %161 = tpu.matmul %158, %160, %cst_59 {dimension_numbers = #tpu.dot_dimension_numbers<[1], [0], [0], [1], [0, 0, 1, 1], [], []>} : vector<16x32xbf16>, vector<32x64xbf16>, vector<16x64xf32> -> vector<16x64xf32>
    %c0_60 = arith.constant 0 : index
    %c0_61 = arith.constant 0 : index
    %c0_62 = arith.constant 0 : index
    %162 = vector.load %arg11[%c0_60, %c0_61, %c0_62] : memref<2x1x64xf32, #tpu.memory_space<vmem>>, vector<1x1x64xf32>
    %163 = vector.shape_cast %162 : vector<1x1x64xf32> to vector<1x64xf32>
    %164 = vector.broadcast %163 : vector<1x64xf32> to vector<16x64xf32>
    %165 = arith.addf %161, %164 : vector<16x64xf32>
    %166 = arith.mulf %165, %165 : vector<16x64xf32>
    %167 = arith.mulf %165, %166 : vector<16x64xf32>
    %cst_63 = arith.constant 4.471500e-02 : f32
    %168 = vector.broadcast %cst_63 : f32 to vector<16x64xf32>
    %169 = arith.mulf %168, %167 : vector<16x64xf32>
    %170 = arith.addf %165, %169 : vector<16x64xf32>
    %cst_64 = arith.constant 0.797884583 : f32
    %171 = vector.broadcast %cst_64 : f32 to vector<16x64xf32>
    %172 = arith.mulf %171, %170 : vector<16x64xf32>
    %173 = math.tanh %172 : vector<16x64xf32>
    %cst_65 = arith.constant 1.000000e+00 : f32
    %174 = vector.broadcast %cst_65 : f32 to vector<16x64xf32>
    %175 = arith.addf %174, %173 : vector<16x64xf32>
    %cst_66 = arith.constant 5.000000e-01 : f32
    %176 = vector.broadcast %cst_66 : f32 to vector<16x64xf32>
    %177 = arith.mulf %176, %175 : vector<16x64xf32>
    %178 = arith.mulf %165, %177 : vector<16x64xf32>
    %179 = arith.truncf %178 : vector<16x64xf32> to vector<16x64xbf16>
    %c0_67 = arith.constant 0 : index
    %c0_68 = arith.constant 0 : index
    %c0_69 = arith.constant 0 : index
    %180 = vector.load %arg12[%c0_67, %c0_68, %c0_69] : memref<2x64x32xbf16, #tpu.memory_space<vmem>>, vector<1x64x32xbf16>
    %181 = vector.shape_cast %180 : vector<1x64x32xbf16> to vector<64x32xbf16>
    %cst_70 = arith.constant dense<0.000000e+00> : vector<16x32xf32>
    %182 = tpu.matmul %179, %181, %cst_70 {dimension_numbers = #tpu.dot_dimension_numbers<[1], [0], [0], [1], [0, 0, 1, 1], [], []>} : vector<16x64xbf16>, vector<64x32xbf16>, vector<16x32xf32> -> vector<16x32xf32>
    %c0_71 = arith.constant 0 : index
    %c0_72 = arith.constant 0 : index
    %c0_73 = arith.constant 0 : index
    %183 = vector.load %arg13[%c0_71, %c0_72, %c0_73] : memref<2x1x32xf32, #tpu.memory_space<vmem>>, vector<1x1x32xf32>
    %184 = vector.shape_cast %183 : vector<1x1x32xf32> to vector<1x32xf32>
    %185 = vector.broadcast %184 : vector<1x32xf32> to vector<16x32xf32>
    %186 = arith.addf %182, %185 : vector<16x32xf32>
    %187 = arith.addf %157, %186 : vector<16x32xf32>
    %c0_74 = arith.constant 0 : index
    %c0_75 = arith.constant 0 : index
    %c0_76 = arith.constant 0 : index
    %188 = vector.load %arg14[%c0_74, %c0_75, %c0_76] : memref<2x1x32xf32, #tpu.memory_space<vmem>>, vector<1x1x32xf32>
    %189 = vector.shape_cast %188 : vector<1x1x32xf32> to vector<1x32xf32>
    %c0_77 = arith.constant 0 : index
    %c0_78 = arith.constant 0 : index
    %c0_79 = arith.constant 0 : index
    %190 = vector.load %arg15[%c0_77, %c0_78, %c0_79] : memref<2x1x32xf32, #tpu.memory_space<vmem>>, vector<1x1x32xf32>
    %191 = vector.shape_cast %190 : vector<1x1x32xf32> to vector<1x32xf32>
    %cst_80 = arith.constant dense<0.000000e+00> : vector<16xf32>
    %192 = vector.multi_reduction <add>, %187, %cst_80 [1] : vector<16x32xf32> to vector<16xf32>
    %193 = vector.shape_cast %192 : vector<16xf32> to vector<16x1xf32>
    %cst_81 = arith.constant 3.200000e+01 : f32
    %194 = vector.broadcast %cst_81 : f32 to vector<16x1xf32>
    %195 = arith.divf %193, %194 : vector<16x1xf32>
    %196 = vector.broadcast %195 : vector<16x1xf32> to vector<16x32xf32>
    %197 = arith.subf %187, %196 : vector<16x32xf32>
    %198 = arith.mulf %197, %197 : vector<16x32xf32>
    %cst_82 = arith.constant dense<0.000000e+00> : vector<16xf32>
    %199 = vector.multi_reduction <add>, %198, %cst_82 [1] : vector<16x32xf32> to vector<16xf32>
    %200 = vector.shape_cast %199 : vector<16xf32> to vector<16x1xf32>
    %cst_83 = arith.constant 3.200000e+01 : f32
    %201 = vector.broadcast %cst_83 : f32 to vector<16x1xf32>
    %202 = arith.divf %200, %201 : vector<16x1xf32>
    %203 = vector.broadcast %195 : vector<16x1xf32> to vector<16x32xf32>
    %204 = arith.subf %187, %203 : vector<16x32xf32>
    %cst_84 = arith.constant 9.99999996E-13 : f32
    %205 = vector.broadcast %cst_84 : f32 to vector<16x1xf32>
    %206 = arith.addf %202, %205 : vector<16x1xf32>
    %207 = math.rsqrt %206 : vector<16x1xf32>
    %208 = vector.broadcast %207 : vector<16x1xf32> to vector<16x32xf32>
    %209 = arith.mulf %204, %208 : vector<16x32xf32>
    %210 = vector.broadcast %189 : vector<1x32xf32> to vector<16x32xf32>
    %211 = arith.mulf %209, %210 : vector<16x32xf32>
    %212 = vector.broadcast %191 : vector<1x32xf32> to vector<16x32xf32>
    %213 = arith.addf %211, %212 : vector<16x32xf32>
    %214 = arith.truncf %213 : vector<16x32xf32> to vector<16x32xbf16>
    %c1 = arith.constant 1 : index
    %c0_85 = arith.constant 0 : index
    %c0_86 = arith.constant 0 : index
    %215 = vector.load %arg4[%c1, %c0_85, %c0_86] : memref<2x32x96xbf16, #tpu.memory_space<vmem>>, vector<1x32x96xbf16>
    %216 = vector.shape_cast %215 : vector<1x32x96xbf16> to vector<32x96xbf16>
    %cst_87 = arith.constant dense<0.000000e+00> : vector<16x96xf32>
    %217 = tpu.matmul %214, %216, %cst_87 {dimension_numbers = #tpu.dot_dimension_numbers<[1], [0], [0], [1], [0, 0, 1, 1], [], []>} : vector<16x32xbf16>, vector<32x96xbf16>, vector<16x96xf32> -> vector<16x96xf32>
    %c1_88 = arith.constant 1 : index
    %c0_89 = arith.constant 0 : index
    %c0_90 = arith.constant 0 : index
    %218 = vector.load %arg5[%c1_88, %c0_89, %c0_90] : memref<2x1x96xf32, #tpu.memory_space<vmem>>, vector<1x1x96xf32>
    %219 = vector.shape_cast %218 : vector<1x1x96xf32> to vector<1x96xf32>
    %220 = vector.broadcast %219 : vector<1x96xf32> to vector<16x96xf32>
    %221 = arith.addf %217, %220 : vector<16x96xf32>
    %222 = vector.extract_strided_slice %221 {offsets = [0, 0], sizes = [16, 8], strides = [1, 1]} : vector<16x96xf32> to vector<16x8xf32>
    %223 = vector.extract_strided_slice %221 {offsets = [0, 32], sizes = [16, 8], strides = [1, 1]} : vector<16x96xf32> to vector<16x8xf32>
    %224 = vector.extract_strided_slice %221 {offsets = [0, 64], sizes = [16, 8], strides = [1, 1]} : vector<16x96xf32> to vector<16x8xf32>
    %225 = arith.truncf %222 : vector<16x8xf32> to vector<16x8xbf16>
    %226 = arith.truncf %223 : vector<16x8xf32> to vector<16x8xbf16>
    %cst_91 = arith.constant dense<0.000000e+00> : vector<16x16xf32>
    %227 = tpu.matmul %225, %226, %cst_91 {dimension_numbers = #tpu.dot_dimension_numbers<[1], [1], [0], [0], [0, 0, 1, 0], [], []>} : vector<16x8xbf16>, vector<16x8xbf16>, vector<16x16xf32> -> vector<16x16xf32>
    %cst_92 = arith.constant 0.353553385 : f32
    %228 = vector.broadcast %cst_92 : f32 to vector<16x16xf32>
    %229 = arith.mulf %227, %228 : vector<16x16xf32>
    %230 = arith.addf %229, %1 : vector<16x16xf32>
    %cst_93 = arith.constant dense<0xFF800000> : vector<16xf32>
    %231 = vector.multi_reduction <maximumf>, %230, %cst_93 [1] : vector<16x16xf32> to vector<16xf32>
    %232 = vector.shape_cast %231 : vector<16xf32> to vector<16x1xf32>
    %233 = vector.broadcast %232 : vector<16x1xf32> to vector<16x16xf32>
    %234 = arith.subf %230, %233 : vector<16x16xf32>
    %235 = math.exp %234 : vector<16x16xf32>
    %cst_94 = arith.constant dense<0.000000e+00> : vector<16xf32>
    %236 = vector.multi_reduction <add>, %235, %cst_94 [1] : vector<16x16xf32> to vector<16xf32>
    %237 = vector.shape_cast %236 : vector<16xf32> to vector<16x1xf32>
    %238 = tpu.reciprocal %237 {approx = true} : vector<16x1xf32> -> vector<16x1xf32>
    %239 = vector.broadcast %238 : vector<16x1xf32> to vector<16x16xf32>
    %240 = arith.mulf %235, %239 : vector<16x16xf32>
    %241 = arith.truncf %240 : vector<16x16xf32> to vector<16x16xbf16>
    %242 = arith.truncf %224 : vector<16x8xf32> to vector<16x8xbf16>
    %cst_95 = arith.constant dense<0.000000e+00> : vector<16x8xf32>
    %243 = tpu.matmul %241, %242, %cst_95 {dimension_numbers = #tpu.dot_dimension_numbers<[1], [0], [0], [1], [0, 0, 1, 1], [], []>} : vector<16x16xbf16>, vector<16x8xbf16>, vector<16x8xf32> -> vector<16x8xf32>
    %244 = vector.extract_strided_slice %221 {offsets = [0, 8], sizes = [16, 8], strides = [1, 1]} : vector<16x96xf32> to vector<16x8xf32>
    %245 = vector.extract_strided_slice %221 {offsets = [0, 40], sizes = [16, 8], strides = [1, 1]} : vector<16x96xf32> to vector<16x8xf32>
    %246 = vector.extract_strided_slice %221 {offsets = [0, 72], sizes = [16, 8], strides = [1, 1]} : vector<16x96xf32> to vector<16x8xf32>
    %247 = arith.truncf %244 : vector<16x8xf32> to vector<16x8xbf16>
    %248 = arith.truncf %245 : vector<16x8xf32> to vector<16x8xbf16>
    %cst_96 = arith.constant dense<0.000000e+00> : vector<16x16xf32>
    %249 = tpu.matmul %247, %248, %cst_96 {dimension_numbers = #tpu.dot_dimension_numbers<[1], [1], [0], [0], [0, 0, 1, 0], [], []>} : vector<16x8xbf16>, vector<16x8xbf16>, vector<16x16xf32> -> vector<16x16xf32>
    %cst_97 = arith.constant 0.353553385 : f32
    %250 = vector.broadcast %cst_97 : f32 to vector<16x16xf32>
    %251 = arith.mulf %249, %250 : vector<16x16xf32>
    %252 = arith.addf %251, %1 : vector<16x16xf32>
    %cst_98 = arith.constant dense<0xFF800000> : vector<16xf32>
    %253 = vector.multi_reduction <maximumf>, %252, %cst_98 [1] : vector<16x16xf32> to vector<16xf32>
    %254 = vector.shape_cast %253 : vector<16xf32> to vector<16x1xf32>
    %255 = vector.broadcast %254 : vector<16x1xf32> to vector<16x16xf32>
    %256 = arith.subf %252, %255 : vector<16x16xf32>
    %257 = math.exp %256 : vector<16x16xf32>
    %cst_99 = arith.constant dense<0.000000e+00> : vector<16xf32>
    %258 = vector.multi_reduction <add>, %257, %cst_99 [1] : vector<16x16xf32> to vector<16xf32>
    %259 = vector.shape_cast %258 : vector<16xf32> to vector<16x1xf32>
    %260 = tpu.reciprocal %259 {approx = true} : vector<16x1xf32> -> vector<16x1xf32>
    %261 = vector.broadcast %260 : vector<16x1xf32> to vector<16x16xf32>
    %262 = arith.mulf %257, %261 : vector<16x16xf32>
    %263 = arith.truncf %262 : vector<16x16xf32> to vector<16x16xbf16>
    %264 = arith.truncf %246 : vector<16x8xf32> to vector<16x8xbf16>
    %cst_100 = arith.constant dense<0.000000e+00> : vector<16x8xf32>
    %265 = tpu.matmul %263, %264, %cst_100 {dimension_numbers = #tpu.dot_dimension_numbers<[1], [0], [0], [1], [0, 0, 1, 1], [], []>} : vector<16x16xbf16>, vector<16x8xbf16>, vector<16x8xf32> -> vector<16x8xf32>
    %266 = vector.extract_strided_slice %221 {offsets = [0, 16], sizes = [16, 8], strides = [1, 1]} : vector<16x96xf32> to vector<16x8xf32>
    %267 = vector.extract_strided_slice %221 {offsets = [0, 48], sizes = [16, 8], strides = [1, 1]} : vector<16x96xf32> to vector<16x8xf32>
    %268 = vector.extract_strided_slice %221 {offsets = [0, 80], sizes = [16, 8], strides = [1, 1]} : vector<16x96xf32> to vector<16x8xf32>
    %269 = arith.truncf %266 : vector<16x8xf32> to vector<16x8xbf16>
    %270 = arith.truncf %267 : vector<16x8xf32> to vector<16x8xbf16>
    %cst_101 = arith.constant dense<0.000000e+00> : vector<16x16xf32>
    %271 = tpu.matmul %269, %270, %cst_101 {dimension_numbers = #tpu.dot_dimension_numbers<[1], [1], [0], [0], [0, 0, 1, 0], [], []>} : vector<16x8xbf16>, vector<16x8xbf16>, vector<16x16xf32> -> vector<16x16xf32>
    %cst_102 = arith.constant 0.353553385 : f32
    %272 = vector.broadcast %cst_102 : f32 to vector<16x16xf32>
    %273 = arith.mulf %271, %272 : vector<16x16xf32>
    %274 = arith.addf %273, %1 : vector<16x16xf32>
    %cst_103 = arith.constant dense<0xFF800000> : vector<16xf32>
    %275 = vector.multi_reduction <maximumf>, %274, %cst_103 [1] : vector<16x16xf32> to vector<16xf32>
    %276 = vector.shape_cast %275 : vector<16xf32> to vector<16x1xf32>
    %277 = vector.broadcast %276 : vector<16x1xf32> to vector<16x16xf32>
    %278 = arith.subf %274, %277 : vector<16x16xf32>
    %279 = math.exp %278 : vector<16x16xf32>
    %cst_104 = arith.constant dense<0.000000e+00> : vector<16xf32>
    %280 = vector.multi_reduction <add>, %279, %cst_104 [1] : vector<16x16xf32> to vector<16xf32>
    %281 = vector.shape_cast %280 : vector<16xf32> to vector<16x1xf32>
    %282 = tpu.reciprocal %281 {approx = true} : vector<16x1xf32> -> vector<16x1xf32>
    %283 = vector.broadcast %282 : vector<16x1xf32> to vector<16x16xf32>
    %284 = arith.mulf %279, %283 : vector<16x16xf32>
    %285 = arith.truncf %284 : vector<16x16xf32> to vector<16x16xbf16>
    %286 = arith.truncf %268 : vector<16x8xf32> to vector<16x8xbf16>
    %cst_105 = arith.constant dense<0.000000e+00> : vector<16x8xf32>
    %287 = tpu.matmul %285, %286, %cst_105 {dimension_numbers = #tpu.dot_dimension_numbers<[1], [0], [0], [1], [0, 0, 1, 1], [], []>} : vector<16x16xbf16>, vector<16x8xbf16>, vector<16x8xf32> -> vector<16x8xf32>
    %288 = vector.extract_strided_slice %221 {offsets = [0, 24], sizes = [16, 8], strides = [1, 1]} : vector<16x96xf32> to vector<16x8xf32>
    %289 = vector.extract_strided_slice %221 {offsets = [0, 56], sizes = [16, 8], strides = [1, 1]} : vector<16x96xf32> to vector<16x8xf32>
    %290 = vector.extract_strided_slice %221 {offsets = [0, 88], sizes = [16, 8], strides = [1, 1]} : vector<16x96xf32> to vector<16x8xf32>
    %291 = arith.truncf %288 : vector<16x8xf32> to vector<16x8xbf16>
    %292 = arith.truncf %289 : vector<16x8xf32> to vector<16x8xbf16>
    %cst_106 = arith.constant dense<0.000000e+00> : vector<16x16xf32>
    %293 = tpu.matmul %291, %292, %cst_106 {dimension_numbers = #tpu.dot_dimension_numbers<[1], [1], [0], [0], [0, 0, 1, 0], [], []>} : vector<16x8xbf16>, vector<16x8xbf16>, vector<16x16xf32> -> vector<16x16xf32>
    %cst_107 = arith.constant 0.353553385 : f32
    %294 = vector.broadcast %cst_107 : f32 to vector<16x16xf32>
    %295 = arith.mulf %293, %294 : vector<16x16xf32>
    %296 = arith.addf %295, %1 : vector<16x16xf32>
    %cst_108 = arith.constant dense<0xFF800000> : vector<16xf32>
    %297 = vector.multi_reduction <maximumf>, %296, %cst_108 [1] : vector<16x16xf32> to vector<16xf32>
    %298 = vector.shape_cast %297 : vector<16xf32> to vector<16x1xf32>
    %299 = vector.broadcast %298 : vector<16x1xf32> to vector<16x16xf32>
    %300 = arith.subf %296, %299 : vector<16x16xf32>
    %301 = math.exp %300 : vector<16x16xf32>
    %cst_109 = arith.constant dense<0.000000e+00> : vector<16xf32>
    %302 = vector.multi_reduction <add>, %301, %cst_109 [1] : vector<16x16xf32> to vector<16xf32>
    %303 = vector.shape_cast %302 : vector<16xf32> to vector<16x1xf32>
    %304 = tpu.reciprocal %303 {approx = true} : vector<16x1xf32> -> vector<16x1xf32>
    %305 = vector.broadcast %304 : vector<16x1xf32> to vector<16x16xf32>
    %306 = arith.mulf %301, %305 : vector<16x16xf32>
    %307 = arith.truncf %306 : vector<16x16xf32> to vector<16x16xbf16>
    %308 = arith.truncf %290 : vector<16x8xf32> to vector<16x8xbf16>
    %cst_110 = arith.constant dense<0.000000e+00> : vector<16x8xf32>
    %309 = tpu.matmul %307, %308, %cst_110 {dimension_numbers = #tpu.dot_dimension_numbers<[1], [0], [0], [1], [0, 0, 1, 1], [], []>} : vector<16x16xbf16>, vector<16x8xbf16>, vector<16x8xf32> -> vector<16x8xf32>
    %310 = tpu.concatenate %243, %265, %287, %309 in 1 : vector<16x8xf32>, vector<16x8xf32>, vector<16x8xf32>, vector<16x8xf32> -> vector<16x32xf32>
    %311 = arith.truncf %310 : vector<16x32xf32> to vector<16x32xbf16>
    %c1_111 = arith.constant 1 : index
    %c0_112 = arith.constant 0 : index
    %c0_113 = arith.constant 0 : index
    %312 = vector.load %arg6[%c1_111, %c0_112, %c0_113] : memref<2x32x32xbf16, #tpu.memory_space<vmem>>, vector<1x32x32xbf16>
    %313 = vector.shape_cast %312 : vector<1x32x32xbf16> to vector<32x32xbf16>
    %cst_114 = arith.constant dense<0.000000e+00> : vector<16x32xf32>
    %314 = tpu.matmul %311, %313, %cst_114 {dimension_numbers = #tpu.dot_dimension_numbers<[1], [0], [0], [1], [0, 0, 1, 1], [], []>} : vector<16x32xbf16>, vector<32x32xbf16>, vector<16x32xf32> -> vector<16x32xf32>
    %c1_115 = arith.constant 1 : index
    %c0_116 = arith.constant 0 : index
    %c0_117 = arith.constant 0 : index
    %315 = vector.load %arg7[%c1_115, %c0_116, %c0_117] : memref<2x1x32xf32, #tpu.memory_space<vmem>>, vector<1x1x32xf32>
    %316 = vector.shape_cast %315 : vector<1x1x32xf32> to vector<1x32xf32>
    %317 = vector.broadcast %316 : vector<1x32xf32> to vector<16x32xf32>
    %318 = arith.addf %314, %317 : vector<16x32xf32>
    %319 = arith.addf %213, %318 : vector<16x32xf32>
    %c1_118 = arith.constant 1 : index
    %c0_119 = arith.constant 0 : index
    %c0_120 = arith.constant 0 : index
    %320 = vector.load %arg8[%c1_118, %c0_119, %c0_120] : memref<2x1x32xf32, #tpu.memory_space<vmem>>, vector<1x1x32xf32>
    %321 = vector.shape_cast %320 : vector<1x1x32xf32> to vector<1x32xf32>
    %c1_121 = arith.constant 1 : index
    %c0_122 = arith.constant 0 : index
    %c0_123 = arith.constant 0 : index
    %322 = vector.load %arg9[%c1_121, %c0_122, %c0_123] : memref<2x1x32xf32, #tpu.memory_space<vmem>>, vector<1x1x32xf32>
    %323 = vector.shape_cast %322 : vector<1x1x32xf32> to vector<1x32xf32>
    %cst_124 = arith.constant dense<0.000000e+00> : vector<16xf32>
    %324 = vector.multi_reduction <add>, %319, %cst_124 [1] : vector<16x32xf32> to vector<16xf32>
    %325 = vector.shape_cast %324 : vector<16xf32> to vector<16x1xf32>
    %cst_125 = arith.constant 3.200000e+01 : f32
    %326 = vector.broadcast %cst_125 : f32 to vector<16x1xf32>
    %327 = arith.divf %325, %326 : vector<16x1xf32>
    %328 = vector.broadcast %327 : vector<16x1xf32> to vector<16x32xf32>
    %329 = arith.subf %319, %328 : vector<16x32xf32>
    %330 = arith.mulf %329, %329 : vector<16x32xf32>
    %cst_126 = arith.constant dense<0.000000e+00> : vector<16xf32>
    %331 = vector.multi_reduction <add>, %330, %cst_126 [1] : vector<16x32xf32> to vector<16xf32>
    %332 = vector.shape_cast %331 : vector<16xf32> to vector<16x1xf32>
    %cst_127 = arith.constant 3.200000e+01 : f32
    %333 = vector.broadcast %cst_127 : f32 to vector<16x1xf32>
    %334 = arith.divf %332, %333 : vector<16x1xf32>
    %335 = vector.broadcast %327 : vector<16x1xf32> to vector<16x32xf32>
    %336 = arith.subf %319, %335 : vector<16x32xf32>
    %cst_128 = arith.constant 9.99999996E-13 : f32
    %337 = vector.broadcast %cst_128 : f32 to vector<16x1xf32>
    %338 = arith.addf %334, %337 : vector<16x1xf32>
    %339 = math.rsqrt %338 : vector<16x1xf32>
    %340 = vector.broadcast %339 : vector<16x1xf32> to vector<16x32xf32>
    %341 = arith.mulf %336, %340 : vector<16x32xf32>
    %342 = vector.broadcast %321 : vector<1x32xf32> to vector<16x32xf32>
    %343 = arith.mulf %341, %342 : vector<16x32xf32>
    %344 = vector.broadcast %323 : vector<1x32xf32> to vector<16x32xf32>
    %345 = arith.addf %343, %344 : vector<16x32xf32>
    %346 = arith.truncf %345 : vector<16x32xf32> to vector<16x32xbf16>
    %c1_129 = arith.constant 1 : index
    %c0_130 = arith.constant 0 : index
    %c0_131 = arith.constant 0 : index
    %347 = vector.load %arg10[%c1_129, %c0_130, %c0_131] : memref<2x32x64xbf16, #tpu.memory_space<vmem>>, vector<1x32x64xbf16>
    %348 = vector.shape_cast %347 : vector<1x32x64xbf16> to vector<32x64xbf16>
    %cst_132 = arith.constant dense<0.000000e+00> : vector<16x64xf32>
    %349 = tpu.matmul %346, %348, %cst_132 {dimension_numbers = #tpu.dot_dimension_numbers<[1], [0], [0], [1], [0, 0, 1, 1], [], []>} : vector<16x32xbf16>, vector<32x64xbf16>, vector<16x64xf32> -> vector<16x64xf32>
    %c1_133 = arith.constant 1 : index
    %c0_134 = arith.constant 0 : index
    %c0_135 = arith.constant 0 : index
    %350 = vector.load %arg11[%c1_133, %c0_134, %c0_135] : memref<2x1x64xf32, #tpu.memory_space<vmem>>, vector<1x1x64xf32>
    %351 = vector.shape_cast %350 : vector<1x1x64xf32> to vector<1x64xf32>
    %352 = vector.broadcast %351 : vector<1x64xf32> to vector<16x64xf32>
    %353 = arith.addf %349, %352 : vector<16x64xf32>
    %354 = arith.mulf %353, %353 : vector<16x64xf32>
    %355 = arith.mulf %353, %354 : vector<16x64xf32>
    %cst_136 = arith.constant 4.471500e-02 : f32
    %356 = vector.broadcast %cst_136 : f32 to vector<16x64xf32>
    %357 = arith.mulf %356, %355 : vector<16x64xf32>
    %358 = arith.addf %353, %357 : vector<16x64xf32>
    %cst_137 = arith.constant 0.797884583 : f32
    %359 = vector.broadcast %cst_137 : f32 to vector<16x64xf32>
    %360 = arith.mulf %359, %358 : vector<16x64xf32>
    %361 = math.tanh %360 : vector<16x64xf32>
    %cst_138 = arith.constant 1.000000e+00 : f32
    %362 = vector.broadcast %cst_138 : f32 to vector<16x64xf32>
    %363 = arith.addf %362, %361 : vector<16x64xf32>
    %cst_139 = arith.constant 5.000000e-01 : f32
    %364 = vector.broadcast %cst_139 : f32 to vector<16x64xf32>
    %365 = arith.mulf %364, %363 : vector<16x64xf32>
    %366 = arith.mulf %353, %365 : vector<16x64xf32>
    %367 = arith.truncf %366 : vector<16x64xf32> to vector<16x64xbf16>
    %c1_140 = arith.constant 1 : index
    %c0_141 = arith.constant 0 : index
    %c0_142 = arith.constant 0 : index
    %368 = vector.load %arg12[%c1_140, %c0_141, %c0_142] : memref<2x64x32xbf16, #tpu.memory_space<vmem>>, vector<1x64x32xbf16>
    %369 = vector.shape_cast %368 : vector<1x64x32xbf16> to vector<64x32xbf16>
    %cst_143 = arith.constant dense<0.000000e+00> : vector<16x32xf32>
    %370 = tpu.matmul %367, %369, %cst_143 {dimension_numbers = #tpu.dot_dimension_numbers<[1], [0], [0], [1], [0, 0, 1, 1], [], []>} : vector<16x64xbf16>, vector<64x32xbf16>, vector<16x32xf32> -> vector<16x32xf32>
    %c1_144 = arith.constant 1 : index
    %c0_145 = arith.constant 0 : index
    %c0_146 = arith.constant 0 : index
    %371 = vector.load %arg13[%c1_144, %c0_145, %c0_146] : memref<2x1x32xf32, #tpu.memory_space<vmem>>, vector<1x1x32xf32>
    %372 = vector.shape_cast %371 : vector<1x1x32xf32> to vector<1x32xf32>
    %373 = vector.broadcast %372 : vector<1x32xf32> to vector<16x32xf32>
    %374 = arith.addf %370, %373 : vector<16x32xf32>
    %375 = arith.addf %345, %374 : vector<16x32xf32>
    %c1_147 = arith.constant 1 : index
    %c0_148 = arith.constant 0 : index
    %c0_149 = arith.constant 0 : index
    %376 = vector.load %arg14[%c1_147, %c0_148, %c0_149] : memref<2x1x32xf32, #tpu.memory_space<vmem>>, vector<1x1x32xf32>
    %377 = vector.shape_cast %376 : vector<1x1x32xf32> to vector<1x32xf32>
    %c1_150 = arith.constant 1 : index
    %c0_151 = arith.constant 0 : index
    %c0_152 = arith.constant 0 : index
    %378 = vector.load %arg15[%c1_150, %c0_151, %c0_152] : memref<2x1x32xf32, #tpu.memory_space<vmem>>, vector<1x1x32xf32>
    %379 = vector.shape_cast %378 : vector<1x1x32xf32> to vector<1x32xf32>
    %cst_153 = arith.constant dense<0.000000e+00> : vector<16xf32>
    %380 = vector.multi_reduction <add>, %375, %cst_153 [1] : vector<16x32xf32> to vector<16xf32>
    %381 = vector.shape_cast %380 : vector<16xf32> to vector<16x1xf32>
    %cst_154 = arith.constant 3.200000e+01 : f32
    %382 = vector.broadcast %cst_154 : f32 to vector<16x1xf32>
    %383 = arith.divf %381, %382 : vector<16x1xf32>
    %384 = vector.broadcast %383 : vector<16x1xf32> to vector<16x32xf32>
    %385 = arith.subf %375, %384 : vector<16x32xf32>
    %386 = arith.mulf %385, %385 : vector<16x32xf32>
    %cst_155 = arith.constant dense<0.000000e+00> : vector<16xf32>
    %387 = vector.multi_reduction <add>, %386, %cst_155 [1] : vector<16x32xf32> to vector<16xf32>
    %388 = vector.shape_cast %387 : vector<16xf32> to vector<16x1xf32>
    %cst_156 = arith.constant 3.200000e+01 : f32
    %389 = vector.broadcast %cst_156 : f32 to vector<16x1xf32>
    %390 = arith.divf %388, %389 : vector<16x1xf32>
    %391 = vector.broadcast %383 : vector<16x1xf32> to vector<16x32xf32>
    %392 = arith.subf %375, %391 : vector<16x32xf32>
    %cst_157 = arith.constant 9.99999996E-13 : f32
    %393 = vector.broadcast %cst_157 : f32 to vector<16x1xf32>
    %394 = arith.addf %390, %393 : vector<16x1xf32>
    %395 = math.rsqrt %394 : vector<16x1xf32>
    %396 = vector.broadcast %395 : vector<16x1xf32> to vector<16x32xf32>
    %397 = arith.mulf %392, %396 : vector<16x32xf32>
    %398 = vector.broadcast %377 : vector<1x32xf32> to vector<16x32xf32>
    %399 = arith.mulf %397, %398 : vector<16x32xf32>
    %400 = vector.broadcast %379 : vector<1x32xf32> to vector<16x32xf32>
    %401 = arith.addf %399, %400 : vector<16x32xf32>
    %402 = vector.extract_strided_slice %401 {offsets = [0, 0], sizes = [1, 32], strides = [1, 1]} : vector<16x32xf32> to vector<1x32xf32>
    %403 = vector.extract_strided_slice %401 {offsets = [8, 0], sizes = [1, 32], strides = [1, 1]} : vector<16x32xf32> to vector<1x32xf32>
    %404 = tpu.concatenate %402, %403 in 0 : vector<1x32xf32>, vector<1x32xf32> -> vector<2x32xf32>
    %405 = arith.truncf %404 : vector<2x32xf32> to vector<2x32xbf16>
    %c0_158 = arith.constant 0 : index
    %c0_159 = arith.constant 0 : index
    %406 = vector.load %arg16[%c0_158, %c0_159] : memref<32x128xbf16, #tpu.memory_space<vmem>>, vector<32x128xbf16>
    %cst_160 = arith.constant dense<0.000000e+00> : vector<2x128xf32>
    %407 = tpu.matmul %405, %406, %cst_160 {dimension_numbers = #tpu.dot_dimension_numbers<[1], [0], [0], [1], [0, 0, 1, 1], [], []>} : vector<2x32xbf16>, vector<32x128xbf16>, vector<2x128xf32> -> vector<2x128xf32>
    %c0_161 = arith.constant 0 : index
    %c0_162 = arith.constant 0 : index
    %408 = vector.load %arg17[%c0_161, %c0_162] : memref<1x128xf32, #tpu.memory_space<vmem>>, vector<1x128xf32>
    %409 = vector.broadcast %408 : vector<1x128xf32> to vector<2x128xf32>
    %410 = arith.addf %407, %409 : vector<2x128xf32>
    %c0_163 = arith.constant 0 : index
    %c0_164 = arith.constant 0 : index
    %411 = vector.load %arg18[%c0_163, %c0_164] : memref<2x128xf32, #tpu.memory_space<vmem>>, vector<2x128xf32>
    tpu.vector_store %arg18[%c0_163, %c0_164], %410 {strides = array<i32>} : memref<2x128xf32, #tpu.memory_space<vmem>>, vector<2x128xf32>,
    return
  }
}

</mosaic_0001>

<bundles_post_ra>
// kernel: tpu_custom_call.1
= control target key start
LH: loop header
LB: loop body
LE: loop exit
PB: predicated region body
PF: predicated region fallthrough
CT: control target
= control target key end

     0   :  { %s3409_s0 = inlined_call_operand.hbm [shape: f32[16,32], index: 0, kind: input, shape index: {}]   ;;  %s3410_s1 = inlined_call_operand.hbm [shape: f32[16,16], index: 1, kind: input, shape index: {}]   ;;  %s3411_s2 = inlined_call_operand.hbm [shape: f32[1,32], index: 2, kind: input, shape index: {}]   ;;  %s3412_s3 = inlined_call_operand.hbm [shape: f32[1,32], index: 3, kind: input, shape index: {}]   ;;  %s3413_s4 = inlined_call_operand.vmem [shape: bf16[2,32,96], index: 4, kind: input, shape index: {}]   ;;  %s3414_s5 = inlined_call_operand.hbm [shape: f32[2,1,96], index: 5, kind: input, shape index: {}]   ;;  %s3415_s6 = inlined_call_operand.vmem [shape: bf16[2,32,32], index: 6, kind: input, shape index: {}]   ;;  %s3416_s7 = inlined_call_operand.hbm [shape: f32[2,1,32], index: 7, kind: input, shape index: {}]   ;;  %s3417_s8 = inlined_call_operand.hbm [shape: f32[2,1,32], index: 8, kind: input, shape index: {}]   ;;  %s3418_s9 = inlined_call_operand.hbm [shape: f32[2,1,32], index: 9, kind: input, shape index: {}]   ;;  %s3419_s10 = inlined_call_operand.vmem [shape: bf16[2,32,64], index: 10, kind: input, shape index: {}]   ;;  %s3420_s11 = inlined_call_operand.vmem [shape: f32[2,1,64], index: 11, kind: input, shape index: {}]   ;;  %s3421_s12 = inlined_call_operand.vmem [shape: bf16[2,64,32], index: 12, kind: input, shape index: {}]   ;;  %s3422_s13 = inlined_call_operand.vmem [shape: f32[2,1,32], index: 13, kind: input, shape index: {}]   ;;  %s3423_s14 = inlined_call_operand.vmem [shape: f32[2,1,32], index: 14, kind: input, shape index: {}]   ;;  %s3424_s15 = inlined_call_operand.vmem [shape: f32[2,1,32], index: 15, kind: input, shape index: {}]   ;;  %s3425_s16 = inlined_call_operand.vmem [shape: bf16[32,128], index: 16, kind: input, shape index: {}]   ;;  %s3426_s17 = inlined_call_operand.vmem [shape: f32[1,128], index: 17, kind: input, shape index: {}]   ;;  %s3427_s18 = inlined_call_operand.hbm [shape: f32[2,128], index: 18, kind: output, shape index: {}]  }
   0x1   :  { %3429 = sst [smem:[#allocation23_spill]] %s3409_s0 }
   0x2   :  { %3430 = sst [smem:[#allocation24_spill]] %s3410_s1 }
   0x3   :  { %3431 = sst [smem:[#allocation25_spill]] %s3411_s2 }
   0x4   :  { %23 = vsyncpa [#allocation3], 0 }
   0x5   :  { %24 = vsyncpa [#allocation6], 0 }
   0x6   :  { %25 = vsyncpa [#allocation9], 0 }
   0x7   :  { %26 = vsyncpa [#allocation12], 0 }
   0x8   :  { %27 = vsyncpa [#allocation15], 0 }
   0x9   :  { %28 = vsyncpa [#allocation4], 0  ;;  %s2872_s27 = smov [#allocation5]   ;;  %s2873_s29 = smov [#allocation8]  }
   0xa   :  { %s46_s28 = sshll.u32 %s2872_s27, 4  ;;  %s69_s30 = sshll.u32 %s2873_s29, 4  ;;  %s47_s28 = int_to_ptr.vmem [resolvable:$true] %s46_s28  ;;  %s70_s30 = int_to_ptr.vmem [resolvable:$true] %s69_s30 }
   0xb   :  { %s2688_s0 = scalar_lea.vmem %s47_s28, 256  ;;  %p2693_p1 = scmp.lt.s32.totalorder %s47_s28, %s47_s28 }
   0xc   :  { %p2689_p0 = scmp.ne.s32.totalorder %s47_s28, %s2688_s0  ;;  %p2694_p2 = scmp.lt.s32.totalorder %s2688_s0, %s2688_s0 }
   0xe   :  { %p2695_p3 = por %p2694_p2, %p2693_p1 }
  0x10   :  { %p2696_p4 = pnand %p2695_p3, %p2689_p0 }
  0x12   :  { %2699 = shalt.err (!%p2696_p4)
}
  0x13   :  { %s2874_s19 = smov 128   ;;  %s2875_s1 = smov 8  }
  0x14   :  { %s3432_s22 = sld [smem:[#allocation24_spill]]  ;;  %s2708_s2 = scalar_lea.vmem %s70_s30, 16 }
  0x15   :  { %p2709_p5 = scmp.ne.s32.totalorder %s70_s30, %s2708_s2  ;;  %s2712_s23 = scalar_lea.vmem %s70_s30, 32 }
  0x16   :  { %p2713_p6 = scmp.lt.s32.totalorder %s70_s30, %s70_s30  ;;  %p2714_p7 = scmp.lt.s32.totalorder %s2712_s23, %s2708_s2 }
  0x18   :  { %p2715_p8 = por %p2714_p7, %p2713_p6 }
  0x1a   :  { %52 = dma.hbm_to_vmem [thread:$0]  %s3432_s22, 256, %s47_s28, [#allocation6], %s2874_s19, %s2874_s19, %s2875_s1  }
  0x1b   :  { %p2716_p9 = pnand %p2715_p8, %p2709_p5 }
  0x1d   :  { %2719 = shalt.err (!%p2716_p9)
}
  0x1e   :  { %72 = dma.hbm_to_vmem [thread:$0]  %s3412_s3, 16, %s70_s30, [#allocation9]  }
  0x1f   :  { %s2876_s26 = smov [#allocation11]   ;;  %s2877_s29 = smov [#allocation2]  }
  0x20   :  { %s94_s27 = sshll.u32 %s2876_s26, 4  ;;  %s34_s0 = sshll.u32 %s2877_s29, 4  ;;  %s95_s27 = int_to_ptr.vmem [resolvable:$true] %s94_s27  ;;  %s35_s0 = int_to_ptr.vmem [resolvable:$true] %s34_s0 }
  0x21   :  { %s2728_s20 = scalar_lea.vmem %s95_s27, 32  ;;  %p2733_p11 = scmp.lt.s32.totalorder %s95_s27, %s95_s27 }
  0x22   :  { %p2729_p10 = scmp.ne.s32.totalorder %s95_s27, %s2728_s20  ;;  %p2734_p12 = scmp.lt.s32.totalorder %s2728_s20, %s2728_s20 }
  0x24   :  { %p2735_p13 = por %p2734_p12, %p2733_p11 }
  0x26   :  { %p2736_p0 = pnand %p2735_p13, %p2729_p10 }
  0x28   :  { %2739 = shalt.err (!%p2736_p0)
}
  0x29   :  { %s2878_s28 = smov 16   ;;  %s2879_s21 = smov 1  }
  0x2a   :  { %100 = dma.hbm_to_vmem [thread:$0]  %s3416_s7, 32, %s95_s27, [#allocation12], %s2878_s28, %s2878_s28, %s2879_s21  }
  0x2b   :  { %s2748_s30 = scalar_lea.vmem %s35_s0, 256  ;;  %p2753_p2 = scmp.lt.s32.totalorder %s35_s0, %s35_s0 }
  0x2c   :  { %p2749_p1 = scmp.ne.s32.totalorder %s35_s0, %s2748_s30  ;;  %p2754_p3 = scmp.lt.s32.totalorder %s2748_s30, %s2748_s30 }
  0x2e   :  { %p2755_p4 = por %p2754_p3, %p2753_p2 }
  0x30   :  { %p2756_p5 = pnand %p2755_p4, %p2749_p1 }
  0x32   :  { %2759 = shalt.err (!%p2756_p5)
}
  0x33   :  { %s3433_s24 = sld [smem:[#allocation23_spill]]  ;;  %s2880_s25 = smov [#allocation7]  }
  0x34   :  { %s59_s26 = sshll.u32 %s2880_s25, 4  ;;  %s2881_s29 = smov [#allocation10]   ;;  %s60_s26 = int_to_ptr.vmem [resolvable:$true] %s59_s26 }
  0x35   :  { %s80_s20 = sshll.u32 %s2881_s29, 4  ;;  %s2768_s7 = scalar_lea.vmem %s60_s26, 16  ;;  %s81_s20 = int_to_ptr.vmem [resolvable:$true] %s80_s20 }
  0x36   :  { %p2769_p6 = scmp.ne.s32.totalorder %s60_s26, %s2768_s7  ;;  %s2772_s27 = scalar_lea.vmem %s60_s26, 32 }
  0x37   :  { %p2773_p7 = scmp.lt.s32.totalorder %s60_s26, %s60_s26  ;;  %p2774_p8 = scmp.lt.s32.totalorder %s2772_s27, %s2768_s7 }
  0x39   :  { %40 = dma.hbm_to_vmem [thread:$0]  %s3433_s24, 256, %s35_s0, [#allocation3], %s2874_s19, %s2874_s19, %s2875_s1  }
  0x3a   :  { %p2775_p9 = por %p2774_p8, %p2773_p7 }
  0x3c   :  { %p2776_p10 = pnand %p2775_p9, %p2769_p6 }
  0x3e   :  { %2779 = shalt.err (!%p2776_p10)
}
  0x3f   :  { %s3434_s30 = sld [smem:[#allocation25_spill]]  ;;  %s2788_s2 = scalar_lea.vmem %s81_s20, 32 }
  0x40   :  { %p2789_p11 = scmp.ne.s32.totalorder %s81_s20, %s2788_s2  ;;  %p2793_p12 = scmp.lt.s32.totalorder %s81_s20, %s81_s20 }
  0x41   :  { %p2794_p13 = scmp.lt.s32.totalorder %s2788_s2, %s2788_s2 }
  0x43   :  { %p2795_p0 = por %p2794_p13, %p2793_p12 }
  0x45   :  { %62 = dma.hbm_to_vmem [thread:$0]  %s3434_s30, 16, %s60_s26, [#allocation6]  }
  0x46   :  { %p2796_p1 = pnand %p2795_p0, %p2789_p11 }
  0x48   :  { %2799 = shalt.err (!%p2796_p1)
}
  0x49   :  { %86 = dma.hbm_to_vmem [thread:$0]  %s3414_s5, 32, %s81_s20, [#allocation9], %s2878_s28, %s2878_s28, %s2879_s21  }
  0x4a   :  { %s2882_s23 = smov [#allocation13]   ;;  %s2883_s25 = smov [#allocation14]  }
  0x4b   :  { %s106_s24 = sshll.u32 %s2882_s23, 4  ;;  %s118_s29 = sshll.u32 %s2883_s25, 4  ;;  %s107_s24 = int_to_ptr.vmem [resolvable:$true] %s106_s24  ;;  %s119_s29 = int_to_ptr.vmem [resolvable:$true] %s118_s29 }
  0x4c   :  { %s2808_s26 = scalar_lea.vmem %s107_s24, 32  ;;  %p2813_p3 = scmp.lt.s32.totalorder %s107_s24, %s107_s24 }
  0x4d   :  { %p2809_p2 = scmp.ne.s32.totalorder %s107_s24, %s2808_s26  ;;  %p2814_p4 = scmp.lt.s32.totalorder %s2808_s26, %s2808_s26 }
  0x4f   :  { %p2815_p5 = por %p2814_p4, %p2813_p3 }
  0x51   :  { %p2816_p6 = pnand %p2815_p5, %p2809_p2 }
  0x53   :  { %2819 = shalt.err (!%p2816_p6)
}
  0x54   :  { %112 = dma.hbm_to_vmem [thread:$0]  %s3417_s8, 32, %s107_s24, [#allocation12], %s2878_s28, %s2878_s28, %s2879_s21  }
  0x55   :  { %s2828_s5 = scalar_lea.vmem %s119_s29, 32  ;;  %p2833_p8 = scmp.lt.s32.totalorder %s119_s29, %s119_s29 }
  0x56   :  { %p2829_p7 = scmp.ne.s32.totalorder %s119_s29, %s2828_s5  ;;  %p2834_p9 = scmp.lt.s32.totalorder %s2828_s5, %s2828_s5 }
  0x58   :  { %p2835_p10 = por %p2834_p9, %p2833_p8 }
  0x5a   :  { %p2836_p11 = pnand %p2835_p10, %p2829_p7 }
  0x5c   :  { %2839 = shalt.err (!%p2836_p11)
}
  0x5d   :  { %124 = dma.hbm_to_vmem [thread:$0]  %s3418_s9, 32, %s119_s29, [#allocation15], %s2878_s28, %s2878_s28, %s2879_s21  }
  0x5e   :  { %2860 = dma.done.wait [#allocation3], 256  }
  0x5f   :  { %2861 = vsyncadd [#allocation3], 4294967040 }
  0x60   :  { %2862 = dma.done.wait [#allocation6], 272  }
  0x61   :  { %2863 = vsyncadd [#allocation6], 4294967024 }
  0x62   :  { %2864 = dma.done.wait [#allocation9], 48  }
  0x63   :  { %2865 = vsyncadd [#allocation9], 4294967248 }
  0x64   :  { %2866 = dma.done.wait [#allocation12], 64  }
  0x65   :  { %2867 = vsyncadd [#allocation12], 4294967232 }
  0x66   :  { %2868 = dma.done.wait [#allocation15], 32  }
  0x67   :  { %2869 = vsyncadd [#allocation15], 4294967264  ;;  %vm172_vm0 = vcmask 261120   ;;  %v166_v0 = vld [vmem:[#allocation2] sm:$0xff]  ;;  %v167_v1 = vld [vmem:[#allocation2 + $0x8] sm:$0xff]  ;;  %v2884_v15 = vmov 0.0  }
  0x68   :  { %v173_v2 = vsel %vm172_vm0, %v166_v0, 0.0  ;;  %v176_v3 = vsel %vm172_vm0, %v167_v1, 0.0  ;;  %v2566_v14 = vld [vmem:[%s3413_s4 + $0x8] sm:$0xff]   ;;  %2333 = vmatprep.subr.bf16.mxu0 %v2884_v15  ;;  %vm2885_vm1 = vmmov 0   ;;  %v2567_v16 = vld [vmem:[%s3413_s4] sm:$0xff]   ;;  %2341 = vmatprep.subr.bf16.mxu1 %v2884_v15  ;;  %s2886_s30 = smov 88  }
  0x69   :  { %174 = vadd.xlane.f32.xlu0 %v173_v2  ;;  %2337 = vmatprep.mubr.msk.bf16.mxu0 %vm2885_vm1, %v2884_v15  ;;  %v2180_v25 = vld [vmem:[#allocation7] ss:$0 sm:$0xff]  ;;  %v2181_v29 = vld [vmem:[#allocation8] ss:$0 sm:$0xff]  ;;  %v2182_v35 = vld [vmem:[#allocation10] ss:$0 sm:$0xff] }
  0x6a   :  { %2334 = vmatpush3.bf16.msra.mxu0 %v2566_v14  ;;  %2343 = vmatprep.mubr.msk.bf16.mxu1 %vm2885_vm1, %v2884_v15  ;;  %s2887_s2 = smov 96   ;;  %s2888_s19 = smov 120   ;;  %vm288_vm2 = vcmask 64512   ;;  %v3100_v54 = vld [vmem:[#allocation5] sm:$0xff]  ;;  %vm340_vm3 = vcmask 130048   ;;  %v3103_v59 = vld [vmem:[#allocation5 + $0x8] sm:$0xff] }
  0x6b   :  { %2335 = vmatprep.subr.bf16.mxu0 %v2884_v15  ;;  %s2889_s0 = smov 112   ;;  %s2890_s23 = smov 80   ;;  %vm814_vm4 = vcmask 195584   ;;  %vm1057_vm5 = vcmask 523264   ;;  %vm2091_vm6 = vcmask 1040384  }
  0x6c   :  { %s2891_s24 = smov 104   ;;  %s2892_s25 = smov 72  }
  0x6d   :  { %177 = vadd.xlane.f32.xlu0 %v176_v3  ;;  %s2893_s29 = smov 64   ;;  %s2894_s26 = smov 48  }
  0x6e   :  { %2336 = vmatpush3.bf16.msra.mxu0 %v2567_v16  ;;  %s2895_s7 = smov 40   ;;  %s2896_s27 = smov 56  }
  0x6f   :  { %2347 = vmatprep.subr.bf16.mxu0 %v2884_v15  ;;  %s3428_s9 = smov 24  }
  0xf2   :  { %v175_v4 = vpop.xlane.xlu0 %174 }
  0xf3   :  { %v180_v5 = vmul.f32 0.03125, %v175_v4 }
  0xf5   :  { %v182_v6 = vsub.f32 %v166_v0, %v180_v5 }
  0xf6   :  { %v178_v7 = vpop.xlane.xlu0 %177 }
  0xf7   :  { %v181_v8 = vmul.f32 0.03125, %v178_v7  ;;  %v184_v9 = vmul.f32 %v182_v6, %v182_v6 }
  0xf9   :  { %v183_v10 = vsub.f32 %v167_v1, %v181_v8  ;;  %v186_v11 = vsel %vm172_vm0, %v184_v9, 0.0 }
  0xfa   :  { %187 = vadd.xlane.f32.xlu1 %v186_v11 }
  0xfb   :  { %v185_v12 = vmul.f32 %v183_v10, %v183_v10 }
  0xfd   :  { %v189_v13 = vsel %vm172_vm0, %v185_v12, 0.0 }
  0xfe   :  { %190 = vadd.xlane.f32.xlu1 %v189_v13 }
 0x183   :  { %v188_v17 = vpop.xlane.xlu1 %187 }
 0x184   :  { %v192_v18 = vmul.f32 0.03125, %v188_v17 }
 0x186   :  { %v194_v19 = vadd.f32 1e-12, %v192_v18 }
 0x187   :  { %v191_v20 = vpop.xlane.xlu1 %190 }
 0x188   :  { %2588 = vrsqrt.f32 %v194_v19  ;;  %v193_v21 = vmul.f32 0.03125, %v191_v20 }
 0x18a   :  { %v195_v22 = vadd.f32 1e-12, %v193_v21 }
 0x18c   :  { %2590 = vrsqrt.f32 %v195_v22 }
 0x195   :  { %v2589_v23 = vpop.eup %2588 }
 0x196   :  { %v198_v24 = vmul.f32 %v2589_v23, %v182_v6 }
 0x198   :  { %v206_v28 = vmul.f32 %v2180_v25, %v198_v24 }
 0x199   :  { %v2591_v26 = vpop.eup %2590 }
 0x19a   :  { %v199_v27 = vmul.f32 %v2591_v26, %v183_v10  ;;  %v3054_v31 = vadd.f32 %v2181_v29, %v206_v28 }
 0x19c   :  { %v207_v30 = vmul.f32 %v2180_v25, %v199_v27 }
 0x19e   :  { %v3056_v32 = vadd.f32 %v2181_v29, %v207_v30 }
 0x1a0   :  { %v216_v33 = vpack.c.bf16 %v3056_v32, %v3054_v31 }
 0x1a2   :  { %2338 = vmatmul.mubr.msk.bf16.vlgmr.msra.gmra.mxu0 %vm172_vm0, %v216_v33 }
 0x1a3   :  { %2349 = vmatprep.mubr.msk.bf16.mxu0 %vm2885_vm1, %v2884_v15 }
 0x262   :  { %v277_v34 = vpop.f32.mrf.mxu0 }
 0x263   :  { %v278_v38 = vadd.f32 %v2182_v35, %v277_v34 }
 0x264   :  { %v2339_v36 = vpop.f32.mrf.mxu0 }
 0x266   :  { %v280_v37 = vpop.f32.mrf.mxu0 }
 0x267   :  { %v281_v39 = vadd.f32 %v2182_v35, %v280_v37 }
 0x268   :  { %v2340_v40 = vpop.f32.mrf.mxu0 }
 0x269   :  { %v3063_v41 = vpack.c.bf16 %v281_v39, %v278_v38 }
 0x26b   :  { %413 = vrot.lane.b32.xlu1 %v3063_v41, %s2886_s30  ;;  %286 = vrot.lane.b32.xlu0 %v3063_v41, %s2887_s2 }
 0x26f   :  { %411 = vrot.lane.b32.xlu1 %v3063_v41, %s2888_s19  ;;  %536 = vrot.lane.b32.xlu0 %v3063_v41, %s2889_s0 }
 0x273   :  { %538 = vrot.lane.b32.xlu1 %v3063_v41, %s2890_s23  ;;  %661 = vrot.lane.b32.xlu0 %v3063_v41, %s2891_s24 }
 0x277   :  { %663 = vrot.lane.b32.xlu1 %v3063_v41, %s2892_s25 }
 0x2dd   :  { %v287_v42 = vpop.permute.xlu0 %286  ;;  %v414_v44 = vpop.permute.xlu1 %413 }
 0x2de   :  { %v293_v43 = vsel %vm288_vm2, %v287_v42, 0  ;;  %v419_v46 = vsel %vm288_vm2, %v414_v44, 0 }
 0x2df   :  { %2342 = vmatpush3.bf16.xpose.msra.mxu1 %v293_v43 }
 0x2e0   :  { %2353 = vmatprep.subr.bf16.mxu1 %v2884_v15 }
 0x2e1   :  { %v412_v45 = vpop.permute.xlu1 %411  ;;  %v537_v50 = vpop.permute.xlu0 %536 }
 0x2e5   :  { %v539_v47 = vpop.permute.xlu1 %538  ;;  %v662_v52 = vpop.permute.xlu0 %661 }
 0x2e6   :  { %2344 = vmatmul.mubr.msk.bf16.vlgmr.msra.gmra.mxu1 %vm288_vm2, %v3063_v41  ;;  %v544_v48 = vsel %vm288_vm2, %v539_v47, 0 }
 0x2e7   :  { %2354 = vmatpush3.bf16.xpose.msra.mxu1 %v419_v46  ;;  %2355 = vmatprep.mubr.msk.bf16.mxu1 %vm2885_vm1, %v2884_v15 }
 0x2e8   :  { %2365 = vmatprep.subr.bf16.mxu1 %v2884_v15 }
 0x2e9   :  { %v664_v49 = vpop.permute.xlu1 %663 }
 0x2ea   :  { %v669_v51 = vsel %vm288_vm2, %v664_v49, 0 }
 0x2ee   :  { %2356 = vmatmul.mubr.msk.bf16.vlgmr.msra.gmra.mxu1 %vm288_vm2, %v412_v45 }
 0x2ef   :  { %2366 = vmatpush3.bf16.xpose.msra.mxu1 %v544_v48  ;;  %2367 = vmatprep.mubr.msk.bf16.mxu1 %vm2885_vm1, %v2884_v15 }
 0x2f0   :  { %2377 = vmatprep.subr.bf16.mxu1 %v2884_v15 }
 0x2f6   :  { %2368 = vmatmul.mubr.msk.bf16.vlgmr.msra.gmra.mxu1 %vm288_vm2, %v537_v50 }
 0x2f7   :  { %2378 = vmatpush3.bf16.xpose.msra.mxu1 %v669_v51  ;;  %2379 = vmatprep.mubr.msk.bf16.mxu1 %vm2885_vm1, %v2884_v15 }
 0x2f8   :  { %2389 = vmatprep.subr.bf16.mxu1 %v2884_v15 }
 0x2fe   :  { %2380 = vmatmul.mubr.msk.bf16.vlgmr.msra.gmra.mxu1 %vm288_vm2, %v662_v52 }
 0x2ff   :  { %2393 = vmatprep.mubr.msk.bf16.mxu1 %vm2885_vm1, %v2884_v15 }
 0x3a6   :  { %v329_v53 = vpop.f32.mrf.mxu1 }
 0x3a7   :  { %v336_v55 = vmul.f32 0.35355338, %v329_v53 }
 0x3a8   :  { %v2345_v56 = vpop.f32.mrf.mxu1 }
 0x3a9   :  { %v338_v57 = vadd.f32 %v336_v55, %v3100_v54 }
 0x3aa   :  { %v332_v58 = vpop.f32.mrf.mxu1 }
 0x3ab   :  { %v337_v60 = vmul.f32 0.35355338, %v332_v58  ;;  %v341_v61 = vsel %vm340_vm3, %v338_v57, -inf }
 0x3ac   :  { %342 = vmax.xlane.f32.xlu1 %v341_v61  ;;  %v2346_v62 = vpop.f32.mrf.mxu1 }
 0x3ad   :  { %v339_v63 = vadd.f32 %v337_v60, %v3103_v59 }
 0x3ae   :  { %v455_v0 = vpop.f32.mrf.mxu1 }
 0x3af   :  { %v462_v1 = vmul.f32 0.35355338, %v455_v0  ;;  %v344_v2 = vsel %vm340_vm3, %v339_v63, -inf }
 0x3b0   :  { %345 = vmax.xlane.f32.xlu0 %v344_v2  ;;  %v2357_v3 = vpop.f32.mrf.mxu1 }
 0x3b1   :  { %v464_v4 = vadd.f32 %v462_v1, %v3100_v54 }
 0x3b2   :  { %v458_v5 = vpop.f32.mrf.mxu1 }
 0x3b3   :  { %v463_v6 = vmul.f32 0.35355338, %v458_v5  ;;  %v466_v7 = vsel %vm340_vm3, %v464_v4, -inf }
 0x3b4   :  { %467 = vmax.xlane.f32.xlu0 %v466_v7  ;;  %v2358_v8 = vpop.f32.mrf.mxu1 }
 0x3b5   :  { %v465_v9 = vadd.f32 %v463_v6, %v3103_v59 }
 0x3b6   :  { %v580_v10 = vpop.f32.mrf.mxu1 }
 0x3b7   :  { %v587_v11 = vmul.f32 0.35355338, %v580_v10  ;;  %v469_v12 = vsel %vm340_vm3, %v465_v9, -inf }
 0x3b8   :  { %470 = vmax.xlane.f32.xlu0 %v469_v12  ;;  %v2369_v13 = vpop.f32.mrf.mxu1 }
 0x3b9   :  { %v589_v14 = vadd.f32 %v587_v11, %v3100_v54 }
 0x3ba   :  { %v583_v16 = vpop.f32.mrf.mxu1 }
 0x3bb   :  { %v588_v17 = vmul.f32 0.35355338, %v583_v16  ;;  %v591_v18 = vsel %vm340_vm3, %v589_v14, -inf }
 0x3bc   :  { %592 = vmax.xlane.f32.xlu1 %v591_v18  ;;  %v2370_v19 = vpop.f32.mrf.mxu1 }
 0x3bd   :  { %v590_v20 = vadd.f32 %v588_v17, %v3103_v59 }
 0x3be   :  { %v705_v21 = vpop.f32.mrf.mxu1 }
 0x3bf   :  { %v712_v22 = vmul.f32 0.35355338, %v705_v21  ;;  %v594_v23 = vsel %vm340_vm3, %v590_v20, -inf }
 0x3c0   :  { %595 = vmax.xlane.f32.xlu0 %v594_v23  ;;  %v2381_v24 = vpop.f32.mrf.mxu1 }
 0x3c1   :  { %v714_v25 = vadd.f32 %v712_v22, %v3100_v54 }
 0x3c2   :  { %v708_v26 = vpop.f32.mrf.mxu1 }
 0x3c3   :  { %v713_v27 = vmul.f32 0.35355338, %v708_v26  ;;  %v716_v28 = vsel %vm340_vm3, %v714_v25, -inf }
 0x3c4   :  { %717 = vmax.xlane.f32.xlu1 %v716_v28  ;;  %v2382_v29 = vpop.f32.mrf.mxu1 }
 0x3c5   :  { %v715_v30 = vadd.f32 %v713_v27, %v3103_v59 }
 0x3c7   :  { %v719_v33 = vsel %vm340_vm3, %v715_v30, -inf }
 0x3c8   :  { %720 = vmax.xlane.f32.xlu0 %v719_v33 }
 0x3d5   :  { %364 = vrot.lane.b32.xlu1 %v3063_v41, %s2893_s29 }
 0x435   :  { %v343_v34 = vpop.xlane.xlu1 %342 }
 0x436   :  { %v347_v35 = vsub.f32 %v338_v57, %v343_v34 }
 0x438   :  { %v349_v36 = vmul.f32 1.442695, %v347_v35 }
 0x439   :  { %v346_v37 = vpop.xlane.xlu0 %345 }
 0x43a   :  { %2592 = vpow2.f32 %v349_v36  ;;  %v348_v38 = vsub.f32 %v339_v63, %v346_v37 }
 0x43c   :  { %v351_v39 = vmul.f32 1.442695, %v348_v38 }
 0x43d   :  { %v468_v40 = vpop.xlane.xlu0 %467 }
 0x43e   :  { %2594 = vpow2.f32 %v351_v39  ;;  %v472_v42 = vsub.f32 %v464_v4, %v468_v40 }
 0x440   :  { %v474_v43 = vmul.f32 1.442695, %v472_v42 }
 0x441   :  { %v471_v44 = vpop.xlane.xlu0 %470 }
 0x442   :  { %2596 = vpow2.f32 %v474_v43  ;;  %v473_v45 = vsub.f32 %v465_v9, %v471_v44 }
 0x444   :  { %v476_v46 = vmul.f32 1.442695, %v473_v45 }
 0x445   :  { %v593_v47 = vpop.xlane.xlu1 %592 }
 0x446   :  { %2598 = vpow2.f32 %v476_v46  ;;  %v597_v48 = vsub.f32 %v589_v14, %v593_v47 }
 0x447   :  { %v2593_v49 = vpop.eup %2592 }
 0x448   :  { %v599_v50 = vmul.f32 1.442695, %v597_v48  ;;  %v353_v51 = vsel %vm340_vm3, %v2593_v49, 0.0 }
 0x449   :  { %354 = vadd.xlane.f32.xlu1 %v353_v51  ;;  %v596_v52 = vpop.xlane.xlu0 %595 }
 0x44a   :  { %2600 = vpow2.f32 %v599_v50  ;;  %v598_v53 = vsub.f32 %v590_v20, %v596_v52 }
 0x44b   :  { %v2595_v55 = vpop.eup %2594 }
 0x44c   :  { %v601_v56 = vmul.f32 1.442695, %v598_v53  ;;  %v356_v57 = vsel %vm340_vm3, %v2595_v55, 0.0 }
 0x44d   :  { %v718_v58 = vpop.xlane.xlu1 %717  ;;  %357 = vadd.xlane.f32.xlu0 %v356_v57 }
 0x44e   :  { %2602 = vpow2.f32 %v601_v56  ;;  %v722_v60 = vsub.f32 %v714_v25, %v718_v58  ;;  %v2568_v56 = vld [vmem:[%s3415_s6 + $0x8] sm:$0xff]  }
 0x44f   :  { %v2597_v61 = vpop.eup %2596  ;;  %2390 = vmatpush3.bf16.msra.mxu1 %v2568_v56  ;;  %v2198_v56 = vld [vmem:[#allocation13] ss:$0 sm:$0xff] }
 0x450   :  { %v724_v62 = vmul.f32 1.442695, %v722_v60  ;;  %v478_v63 = vsel %vm340_vm3, %v2597_v61, 0.0  ;;  %2391 = vmatprep.subr.bf16.mxu1 %v2884_v15 }
 0x451   :  { %v365_v0 = vpop.permute.xlu1 %364  ;;  %479 = vadd.xlane.f32.xlu1 %v478_v63  ;;  %v721_v1 = vpop.xlane.xlu0 %720 }
 0x452   :  { %2604 = vpow2.f32 %v724_v62  ;;  %v723_v2 = vsub.f32 %v715_v30, %v721_v1  ;;  %2348 = vmatpush3.bf16.msra.mxu0 %v365_v0  ;;  %v2569_v62 = vld [vmem:[%s3415_s6] sm:$0xff]  }
 0x453   :  { %v2599_v3 = vpop.eup %2598  ;;  %2359 = vmatprep.subr.bf16.mxu0 %v2884_v15  ;;  %2392 = vmatpush3.bf16.msra.mxu1 %v2569_v62 }
 0x454   :  { %v726_v4 = vmul.f32 1.442695, %v723_v2  ;;  %v481_v5 = vsel %vm340_vm3, %v2599_v3, 0.0  ;;  %2405 = vmatprep.subr.bf16.mxu1 %v2884_v15 }
 0x455   :  { %482 = vadd.xlane.f32.xlu0 %v481_v5 }
 0x456   :  { %2606 = vpow2.f32 %v726_v4 }
 0x457   :  { %v2601_v6 = vpop.eup %2600 }
 0x458   :  { %v603_v7 = vsel %vm340_vm3, %v2601_v6, 0.0 }
 0x459   :  { %604 = vadd.xlane.f32.xlu1 %v603_v7 }
 0x45b   :  { %v2603_v8 = vpop.eup %2602 }
 0x45c   :  { %v606_v9 = vsel %vm340_vm3, %v2603_v8, 0.0 }
 0x45d   :  { %607 = vadd.xlane.f32.xlu0 %v606_v9 }
 0x45f   :  { %v2605_v10 = vpop.eup %2604 }
 0x460   :  { %v728_v11 = vsel %vm340_vm3, %v2605_v10, 0.0 }
 0x461   :  { %729 = vadd.xlane.f32.xlu1 %v728_v11 }
 0x463   :  { %v2607_v12 = vpop.eup %2606 }
 0x464   :  { %v731_v13 = vsel %vm340_vm3, %v2607_v12, 0.0 }
 0x465   :  { %732 = vadd.xlane.f32.xlu0 %v731_v13 }
 0x472   :  { %614 = vrot.lane.b32.xlu1 %v3063_v41, %s2894_s26 }
 0x476   :  { %739 = vrot.lane.b32.xlu1 %v3063_v41, %s2895_s7 }
 0x47b   :  { %489 = vrot.lane.b32.xlu0 %v3063_v41, %s2896_s27 }
 0x4d2   :  { %v355_v14 = vpop.xlane.xlu1 %354 }
 0x4d3   :  { %2608 = vrcp.f32 %v355_v14 }
 0x4d6   :  { %v358_v16 = vpop.xlane.xlu0 %357 }
 0x4d7   :  { %2610 = vrcp.f32 %v358_v16 }
 0x4da   :  { %v480_v18 = vpop.xlane.xlu1 %479 }
 0x4de   :  { %v483_v17 = vpop.xlane.xlu0 %482 }
 0x4df   :  { %2612 = vrcp.f32 %v483_v17 }
 0x4e0   :  { %v2609_v19 = vpop.eup %2608  ;;  %2614 = vrcp.f32 %v480_v18 }
 0x4e1   :  { %v361_v21 = vmul.f32 %v2609_v19, %v2593_v49 }
 0x4e2   :  { %v605_v24 = vpop.xlane.xlu1 %604 }
 0x4e4   :  { %v2611_v20 = vpop.eup %2610 }
 0x4e5   :  { %v362_v22 = vmul.f32 %v2611_v20, %v2595_v55 }
 0x4e6   :  { %v608_v23 = vpop.xlane.xlu0 %607 }
 0x4e7   :  { %v363_v25 = vpack.c.bf16 %v362_v22, %v361_v21  ;;  %2616 = vrcp.f32 %v608_v23 }
 0x4e8   :  { %2618 = vrcp.f32 %v605_v24  ;;  %v2194_v24 = vld [vmem:[#allocation11] ss:$0 sm:$0xff] }
 0x4e9   :  { %2350 = vmatmul.mubr.msk.bf16.vlgmr.msra.gmra.mxu0 %vm340_vm3, %v363_v25 }
 0x4ea   :  { %2361 = vmatprep.mubr.msk.bf16.mxu0 %vm2885_vm1, %v2884_v15  ;;  %v730_v28 = vpop.xlane.xlu1 %729 }
 0x4ec   :  { %v2613_v41 = vpop.eup %2612 }
 0x4ed   :  { %v2615_v27 = vpop.eup %2614  ;;  %v487_v29 = vmul.f32 %v2613_v41, %v2599_v3 }
 0x4ee   :  { %v733_v26 = vpop.xlane.xlu0 %732  ;;  %v486_v33 = vmul.f32 %v2615_v27, %v2597_v61  ;;  %v615_v36 = vpop.permute.xlu1 %614 }
 0x4ef   :  { %2620 = vrcp.f32 %v733_v26 }
 0x4f0   :  { %2622 = vrcp.f32 %v730_v28  ;;  %v488_v34 = vpack.c.bf16 %v487_v29, %v486_v33 }
 0x4f2   :  { %v490_v30 = vpop.permute.xlu0 %489  ;;  %v740_v43 = vpop.permute.xlu1 %739 }
 0x4f3   :  { %2360 = vmatpush3.bf16.msra.mxu0 %v490_v30 }
 0x4f4   :  { %2371 = vmatprep.subr.bf16.mxu0 %v2884_v15  ;;  %v2617_v35 = vpop.eup %2616 }
 0x4f5   :  { %v2619_v37 = vpop.eup %2618  ;;  %v612_v38 = vmul.f32 %v2617_v35, %v2603_v8 }
 0x4f6   :  { %2362 = vmatmul.mubr.msk.bf16.vlgmr.msra.gmra.mxu0 %vm340_vm3, %v488_v34  ;;  %v611_v39 = vmul.f32 %v2619_v37, %v2601_v6 }
 0x4f7   :  { %2372 = vmatpush3.bf16.msra.mxu0 %v615_v36  ;;  %2373 = vmatprep.mubr.msk.bf16.mxu0 %vm2885_vm1, %v2884_v15 }
 0x4f8   :  { %2383 = vmatprep.subr.bf16.mxu0 %v2884_v15  ;;  %v613_v40 = vpack.c.bf16 %v612_v38, %v611_v39 }
 0x4fc   :  { %v2621_v42 = vpop.eup %2620 }
 0x4fd   :  { %v2623_v44 = vpop.eup %2622  ;;  %v737_v45 = vmul.f32 %v2621_v42, %v2607_v12 }
 0x4fe   :  { %2374 = vmatmul.mubr.msk.bf16.vlgmr.msra.gmra.mxu0 %vm340_vm3, %v613_v40  ;;  %v736_v46 = vmul.f32 %v2623_v44, %v2605_v10 }
 0x4ff   :  { %2384 = vmatpush3.bf16.msra.mxu0 %v740_v43  ;;  %2385 = vmatprep.mubr.msk.bf16.mxu0 %vm2885_vm1, %v2884_v15 }
 0x500   :  { %2397 = vmatprep.subr.bf16.mxu0 %v2884_v15  ;;  %v738_v47 = vpack.c.bf16 %v737_v45, %v736_v46  ;;  %v2571_v46 = vld [vmem:[%s3419_s10] sm:$0xff]  }
 0x506   :  { %2386 = vmatmul.mubr.msk.bf16.vlgmr.msra.gmra.mxu0 %vm340_vm3, %v738_v47 }
 0x507   :  { %2401 = vmatprep.mubr.msk.bf16.mxu0 %vm2885_vm1, %v2884_v15 }
 0x5a9   :  { %v404_v48 = vpop.f32.mrf.mxu0 }
 0x5ab   :  { %v2351_v49 = vpop.f32.mrf.mxu0 }
 0x5ad   :  { %v407_v50 = vpop.f32.mrf.mxu0 }
 0x5af   :  { %v2352_v51 = vpop.f32.mrf.mxu0 }
 0x5b6   :  { %v529_v52 = vpop.f32.mrf.mxu0 }
 0x5b8   :  { %v2363_v53 = vpop.f32.mrf.mxu0 }
 0x5ba   :  { %v532_v55 = vpop.f32.mrf.mxu0 }
 0x5bb   :  { %v2536_v57 = vpack.i.bf16 %v532_v55, %v529_v52 }
 0x5bc   :  { %v2364_v58 = vpop.f32.mrf.mxu0 }
 0x5bd   :  { %2537 = vrot.lane.b32.xlu1 %v2536_v57, %s2875_s1 }
 0x5be   :  { %v654_v60 = vpop.f32.mrf.mxu0 }
 0x5c0   :  { %v2375_v61 = vpop.f32.mrf.mxu0 }
 0x5c1   :  { %v2199_v61 = vld [vmem:[#allocation14] ss:$0 sm:$0xff] }
 0x5c2   :  { %v657_v63 = vpop.f32.mrf.mxu0 }
 0x5c3   :  { %v2541_v0 = vpack.i.bf16 %v657_v63, %v654_v60 }
 0x5c4   :  { %v2376_v1 = vpop.f32.mrf.mxu0 }
 0x5c5   :  { %2542 = vrot.lane.b32.xlu0 %v2541_v0, %s2878_s28 }
 0x5c6   :  { %v779_v2 = vpop.f32.mrf.mxu0 }
 0x5c8   :  { %v2387_v3 = vpop.f32.mrf.mxu0 }
 0x5c9   :  { %v2573_v3 = vld [vmem:[%s3421_s12 + $0x10] sm:$0xff]  }
 0x5ca   :  { %v782_v4 = vpop.f32.mrf.mxu0 }
 0x5cb   :  { %v2546_v5 = vpack.i.bf16 %v782_v4, %v779_v2  ;;  %v2572_v2 = vld [vmem:[%s3421_s12 + $0x18] sm:$0xff]   ;;  %v2574_v4 = vld [vmem:[%s3421_s12 + $0x8] sm:$0xff]  }
 0x5cc   :  { %v2388_v6 = vpop.f32.mrf.mxu0 }
 0x5cd   :  { %2547 = vrot.lane.b32.xlu1 %v2546_v5, %s3428_s9  ;;  %v2575_v5 = vld [vmem:[%s3421_s12] sm:$0xff]  }
 0x5ce   :  { %v2200_v6 = vld [vmem:[%s3420_s11] ss:$0 sm:$0xff] }
 0x62f   :  { %v2538_v7 = vpop.permute.xlu1 %2537 }
 0x630   :  { %v2540_v9 = vunpack.i.h.bf16 %v2538_v7  ;;  %v2539_v10 = vunpack.i.l.bf16 %v2538_v7 }
 0x632   :  { %v811_v14 = vsel %vm288_vm2, %v407_v50, %v2540_v9  ;;  %v810_v16 = vsel %vm288_vm2, %v404_v48, %v2539_v10 }
 0x637   :  { %v2543_v8 = vpop.permute.xlu0 %2542 }
 0x638   :  { %v2545_v11 = vunpack.i.h.bf16 %v2543_v8  ;;  %v2544_v12 = vunpack.i.l.bf16 %v2543_v8 }
 0x63a   :  { %v813_v19 = vsel %vm340_vm3, %v811_v14, %v2545_v11  ;;  %v812_v20 = vsel %vm340_vm3, %v810_v16, %v2544_v12 }
 0x63f   :  { %v2548_v13 = vpop.permute.xlu1 %2547 }
 0x640   :  { %v2550_v17 = vunpack.i.h.bf16 %v2548_v13  ;;  %v2549_v18 = vunpack.i.l.bf16 %v2548_v13 }
 0x642   :  { %v816_v21 = vsel %vm814_vm4, %v813_v19, %v2550_v17  ;;  %v815_v22 = vsel %vm814_vm4, %v812_v20, %v2549_v18 }
 0x643   :  { %v817_v23 = vpack.c.bf16 %v816_v21, %v815_v22 }
 0x645   :  { %2394 = vmatmul.mubr.msk.bf16.vlgmr.msra.gmra.mxu1 %vm172_vm0, %v817_v23 }
 0x646   :  { %2413 = vmatprep.mubr.msk.bf16.mxu1 %vm2885_vm1, %v2884_v15  ;;  %2406 = vmatpush3.bf16.msra.mxu1 %v2572_v2  ;;  %v2210_v2 = vld [vmem:[%s3423_s14] ss:$0 sm:$0xff] }
 0x647   :  { %2407 = vmatprep.subr.bf16.mxu1 %v2884_v15 }
 0x64a   :  { %2408 = vmatpush3.bf16.msra.mxu1 %v2573_v3 }
 0x64b   :  { %2409 = vmatprep.subr.bf16.mxu1 %v2884_v15 }
 0x64e   :  { %2410 = vmatpush3.bf16.msra.mxu1 %v2574_v4 }
 0x64f   :  { %2411 = vmatprep.subr.bf16.mxu1 %v2884_v15 }
 0x652   :  { %2412 = vmatpush3.bf16.msra.mxu1 %v2575_v5 }
 0x653   :  { %2431 = vmatprep.subr.bf16.mxu1 %v2884_v15 }
 0x705   :  { %v878_v25 = vpop.f32.mrf.mxu1 }
 0x706   :  { %v879_v41 = vadd.f32 %v2194_v24, %v878_v25 }
 0x707   :  { %v2395_v26 = vpop.f32.mrf.mxu1 }
 0x708   :  { %v885_v27 = vadd.f32 %v879_v41, %v3054_v31 }
 0x709   :  { %v881_v28 = vpop.f32.mrf.mxu1 }
 0x70a   :  { %v882_v29 = vadd.f32 %v2194_v24, %v881_v28  ;;  %v889_v30 = vsel %vm172_vm0, %v885_v27, 0.0 }
 0x70b   :  { %890 = vadd.xlane.f32.xlu0 %v889_v30  ;;  %v2396_v33 = vpop.f32.mrf.mxu1 }
 0x70c   :  { %v886_v34 = vadd.f32 %v882_v29, %v3056_v32  ;;  %v2570_v32 = vld [vmem:[%s3419_s10 + $0x8] sm:$0xff]  }
 0x70d   :  { %2398 = vmatpush3.bf16.msra.mxu0 %v2570_v32 }
 0x70e   :  { %v892_v35 = vsel %vm172_vm0, %v886_v34, 0.0  ;;  %2399 = vmatprep.subr.bf16.mxu0 %v2884_v15 }
 0x70f   :  { %893 = vadd.xlane.f32.xlu1 %v892_v35 }
 0x711   :  { %2400 = vmatpush3.bf16.msra.mxu0 %v2571_v46 }
 0x712   :  { %2417 = vmatprep.subr.bf16.mxu0 %v2884_v15 }
 0x794   :  { %v891_v36 = vpop.xlane.xlu0 %890 }
 0x795   :  { %v895_v37 = vmul.f32 0.03125, %v891_v36 }
 0x797   :  { %v897_v38 = vsub.f32 %v885_v27, %v895_v37 }
 0x798   :  { %v894_v39 = vpop.xlane.xlu1 %893 }
 0x799   :  { %v896_v40 = vmul.f32 0.03125, %v894_v39  ;;  %v899_v42 = vmul.f32 %v897_v38, %v897_v38 }
 0x79b   :  { %v898_v43 = vsub.f32 %v886_v34, %v896_v40  ;;  %v901_v31 = vsel %vm172_vm0, %v899_v42, 0.0  ;;  %v2204_v34 = vld [vmem:[%s3422_s13] ss:$0 sm:$0xff] }
 0x79c   :  { %902 = vadd.xlane.f32.xlu0 %v901_v31 }
 0x79d   :  { %v900_v44 = vmul.f32 %v898_v43, %v898_v43 }
 0x79f   :  { %v904_v45 = vsel %vm172_vm0, %v900_v44, 0.0 }
 0x7a0   :  { %905 = vadd.xlane.f32.xlu0 %v904_v45 }
 0x825   :  { %v903_v47 = vpop.xlane.xlu0 %902 }
 0x826   :  { %v907_v48 = vmul.f32 0.03125, %v903_v47 }
 0x828   :  { %v909_v49 = vadd.f32 1e-12, %v907_v48 }
 0x829   :  { %v906_v50 = vpop.xlane.xlu0 %905 }
 0x82a   :  { %2624 = vrsqrt.f32 %v909_v49  ;;  %v908_v51 = vmul.f32 0.03125, %v906_v50 }
 0x82c   :  { %v910_v52 = vadd.f32 1e-12, %v908_v51 }
 0x82e   :  { %2626 = vrsqrt.f32 %v910_v52 }
 0x837   :  { %v2625_v53 = vpop.eup %2624 }
 0x838   :  { %v913_v55 = vmul.f32 %v2625_v53, %v897_v38 }
 0x83a   :  { %v921_v60 = vmul.f32 %v2198_v56, %v913_v55  ;;  %v2576_v55 = vld [vmem:[%s3413_s4 + $0x18] sm:$0xff]  }
 0x83b   :  { %v2627_v57 = vpop.eup %2626 }
 0x83c   :  { %v914_v58 = vmul.f32 %v2627_v57, %v898_v43  ;;  %v929_v63 = vadd.f32 %v2199_v61, %v921_v60 }
 0x83e   :  { %v922_v62 = vmul.f32 %v2198_v56, %v914_v58  ;;  %v2577_v56 = vld [vmem:[%s3413_s4 + $0x10] sm:$0xff]  }
 0x840   :  { %v930_v0 = vadd.f32 %v2199_v61, %v922_v62 }
 0x842   :  { %v931_v1 = vpack.c.bf16 %v930_v0, %v929_v63 }
 0x844   :  { %2402 = vmatmul.mubr.msk.bf16.vlgmr.msra.gmra.mxu0 %vm172_vm0, %v931_v1 }
 0x845   :  { %2421 = vmatprep.mubr.msk.bf16.mxu0 %vm2885_vm1, %v2884_v15  ;;  %2418 = vmatpush3.bf16.msra.mxu0 %v2576_v55 }
 0x846   :  { %2419 = vmatprep.subr.bf16.mxu0 %v2884_v15 }
 0x849   :  { %2420 = vmatpush3.bf16.msra.mxu0 %v2577_v56 }
 0x84a   :  { %2425 = vmatprep.subr.bf16.mxu0 %v2884_v15 }
 0x904   :  { %v992_v7 = vpop.f32.mrf.mxu0 }
 0x905   :  { %v993_v8 = vadd.f32 %v2200_v6, %v992_v7 }
 0x906   :  { %v2403_v9 = vpop.f32.mrf.mxu0 }
 0x907   :  { %v999_v10 = vmul.f32 %v993_v8, %v993_v8 }
 0x908   :  { %v995_v11 = vpop.f32.mrf.mxu0 }
 0x909   :  { %v1001_v12 = vmul.f32 %v999_v10, %v993_v8  ;;  %v996_v13 = vadd.f32 %v2200_v6, %v995_v11  ;;  %v2211_v6 = vld [vmem:[%s3424_s15] ss:$0 sm:$0xff] }
 0x90a   :  { %v2404_v14 = vpop.f32.mrf.mxu0 }
 0x90b   :  { %v1003_v16 = vmul.f32 0.044715, %v1001_v12  ;;  %v1000_v17 = vmul.f32 %v996_v13, %v996_v13  ;;  %v2216_v12 = vld [vmem:[#allocation10 + $0x1] ss:$0 sm:$0xff] }
 0x90d   :  { %v1005_v18 = vadd.f32 %v1003_v16, %v993_v8  ;;  %v1002_v19 = vmul.f32 %v1000_v17, %v996_v13 }
 0x90f   :  { %v1007_v20 = vmul.f32 0.7978846, %v1005_v18  ;;  %v1004_v21 = vmul.f32 0.044715, %v1002_v19 }
 0x911   :  { %2628 = vtanh.f32 %v1007_v20  ;;  %v1006_v22 = vadd.f32 %v1004_v21, %v996_v13 }
 0x913   :  { %v1008_v23 = vmul.f32 0.7978846, %v1006_v22 }
 0x915   :  { %2630 = vtanh.f32 %v1008_v23 }
 0x91e   :  { %v2629_v24 = vpop.eup %2628 }
 0x91f   :  { %v1011_v25 = vadd.f32 1.0, %v2629_v24 }
 0x921   :  { %v1013_v26 = vmul.f32 0.5, %v1011_v25 }
 0x922   :  { %v2631_v41 = vpop.eup %2630 }
 0x923   :  { %v1012_v27 = vadd.f32 1.0, %v2631_v41  ;;  %v1015_v29 = vmul.f32 %v1013_v26, %v993_v8 }
 0x925   :  { %v1014_v28 = vmul.f32 0.5, %v1012_v27 }
 0x927   :  { %v1016_v30 = vmul.f32 %v1014_v28, %v996_v13 }
 0x929   :  { %v1017_v33 = vpack.c.bf16 %v1016_v30, %v1015_v29 }
 0x92b   :  { %2414 = vmatmul.mubr.msk.bf16.vlgmr.msra.gmra.mxu1 %vm1057_vm5, %v1017_v33 }
 0x92c   :  { %2433 = vmatprep.mubr.msk.bf16.mxu1 %vm2885_vm1, %v2884_v15 }
 0x9eb   :  { %v1095_v35 = vpop.f32.mrf.mxu1 }
 0x9ec   :  { %v1096_v36 = vadd.f32 %v2204_v34, %v1095_v35 }
 0x9ed   :  { %v2415_v37 = vpop.f32.mrf.mxu1 }
 0x9ee   :  { %v1102_v38 = vadd.f32 %v1096_v36, %v929_v63 }
 0x9ef   :  { %v1098_v39 = vpop.f32.mrf.mxu1 }
 0x9f0   :  { %v1099_v40 = vadd.f32 %v2204_v34, %v1098_v39  ;;  %v1106_v42 = vsel %vm172_vm0, %v1102_v38, 0.0 }
 0x9f1   :  { %1107 = vadd.xlane.f32.xlu0 %v1106_v42  ;;  %v2416_v43 = vpop.f32.mrf.mxu1 }
 0x9f2   :  { %v1103_v31 = vadd.f32 %v1099_v40, %v930_v0 }
 0x9f4   :  { %v1109_v44 = vsel %vm172_vm0, %v1103_v31, 0.0 }
 0x9f5   :  { %1110 = vadd.xlane.f32.xlu1 %v1109_v44 }
 0xa7a   :  { %v1108_v45 = vpop.xlane.xlu0 %1107 }
 0xa7b   :  { %v1112_v32 = vmul.f32 0.03125, %v1108_v45 }
 0xa7d   :  { %v1114_v46 = vsub.f32 %v1102_v38, %v1112_v32 }
 0xa7e   :  { %v1111_v47 = vpop.xlane.xlu1 %1110 }
 0xa7f   :  { %v1113_v48 = vmul.f32 0.03125, %v1111_v47  ;;  %v1116_v49 = vmul.f32 %v1114_v46, %v1114_v46 }
 0xa81   :  { %v1115_v50 = vsub.f32 %v1103_v31, %v1113_v48  ;;  %v1118_v51 = vsel %vm172_vm0, %v1116_v49, 0.0 }
 0xa82   :  { %1119 = vadd.xlane.f32.xlu0 %v1118_v51 }
 0xa83   :  { %v1117_v52 = vmul.f32 %v1115_v50, %v1115_v50 }
 0xa85   :  { %v1121_v53 = vsel %vm172_vm0, %v1117_v52, 0.0 }
 0xa86   :  { %1122 = vadd.xlane.f32.xlu1 %v1121_v53 }
 0xb0b   :  { %v1120_v57 = vpop.xlane.xlu0 %1119 }
 0xb0c   :  { %v1124_v58 = vmul.f32 0.03125, %v1120_v57 }
 0xb0e   :  { %v1126_v60 = vadd.f32 1e-12, %v1124_v58 }
 0xb0f   :  { %v1123_v61 = vpop.xlane.xlu1 %1122 }
 0xb10   :  { %2632 = vrsqrt.f32 %v1126_v60  ;;  %v1125_v62 = vmul.f32 0.03125, %v1123_v61 }
 0xb12   :  { %v1127_v63 = vadd.f32 1e-12, %v1125_v62 }
 0xb14   :  { %2634 = vrsqrt.f32 %v1127_v63 }
 0xb1d   :  { %v2633_v0 = vpop.eup %2632 }
 0xb1e   :  { %v1130_v1 = vmul.f32 %v2633_v0, %v1114_v46 }
 0xb20   :  { %v1138_v5 = vmul.f32 %v2210_v2, %v1130_v1 }
 0xb21   :  { %v2635_v3 = vpop.eup %2634 }
 0xb22   :  { %v1131_v4 = vmul.f32 %v2635_v3, %v1115_v50  ;;  %v3232_v8 = vadd.f32 %v2211_v6, %v1138_v5 }
 0xb24   :  { %v1139_v7 = vmul.f32 %v2210_v2, %v1131_v4 }
 0xb26   :  { %v3234_v9 = vadd.f32 %v2211_v6, %v1139_v7 }
 0xb28   :  { %v1148_v10 = vpack.c.bf16 %v3234_v9, %v3232_v8 }
 0xb2a   :  { %2422 = vmatmul.mubr.msk.bf16.vlgmr.msra.gmra.mxu0 %vm172_vm0, %v1148_v10 }
 0xb2b   :  { %2427 = vmatprep.mubr.msk.bf16.mxu0 %vm2885_vm1, %v2884_v15 }
 0xbea   :  { %v1211_v11 = vpop.f32.mrf.mxu0 }
 0xbeb   :  { %v1212_v16 = vadd.f32 %v2216_v12, %v1211_v11 }
 0xbec   :  { %v2423_v13 = vpop.f32.mrf.mxu0 }
 0xbee   :  { %v1214_v14 = vpop.f32.mrf.mxu0 }
 0xbef   :  { %v1215_v17 = vadd.f32 %v2216_v12, %v1214_v14 }
 0xbf0   :  { %v2424_v18 = vpop.f32.mrf.mxu0 }
 0xbf1   :  { %v3241_v19 = vpack.c.bf16 %v1215_v17, %v1212_v16 }
 0xbf3   :  { %1345 = vrot.lane.b32.xlu1 %v3241_v19, %s2886_s30  ;;  %1220 = vrot.lane.b32.xlu0 %v3241_v19, %s2887_s2 }
 0xbf7   :  { %1343 = vrot.lane.b32.xlu1 %v3241_v19, %s2888_s19  ;;  %1468 = vrot.lane.b32.xlu0 %v3241_v19, %s2889_s0 }
 0xbfb   :  { %1470 = vrot.lane.b32.xlu1 %v3241_v19, %s2890_s23  ;;  %1593 = vrot.lane.b32.xlu0 %v3241_v19, %s2891_s24 }
 0xbff   :  { %1595 = vrot.lane.b32.xlu1 %v3241_v19, %s2892_s25 }
 0xc65   :  { %v1221_v20 = vpop.permute.xlu0 %1220  ;;  %v1346_v22 = vpop.permute.xlu1 %1345 }
 0xc66   :  { %v1226_v21 = vsel %vm288_vm2, %v1221_v20, 0  ;;  %v1351_v24 = vsel %vm288_vm2, %v1346_v22, 0 }
 0xc67   :  { %2426 = vmatpush3.bf16.xpose.msra.mxu0 %v1226_v21 }
 0xc68   :  { %2437 = vmatprep.subr.bf16.mxu0 %v2884_v15 }
 0xc69   :  { %v1344_v23 = vpop.permute.xlu1 %1343  ;;  %v1469_v27 = vpop.permute.xlu0 %1468 }
 0xc6d   :  { %v1471_v25 = vpop.permute.xlu1 %1470  ;;  %v1594_v29 = vpop.permute.xlu0 %1593 }
 0xc6e   :  { %2428 = vmatmul.mubr.msk.bf16.vlgmr.msra.gmra.mxu0 %vm288_vm2, %v3241_v19  ;;  %v1476_v41 = vsel %vm288_vm2, %v1471_v25, 0 }
 0xc6f   :  { %2438 = vmatpush3.bf16.xpose.msra.mxu0 %v1351_v24  ;;  %2439 = vmatprep.mubr.msk.bf16.mxu0 %vm2885_vm1, %v2884_v15 }
 0xc70   :  { %2449 = vmatprep.subr.bf16.mxu0 %v2884_v15 }
 0xc71   :  { %v1596_v26 = vpop.permute.xlu1 %1595 }
 0xc72   :  { %v1601_v28 = vsel %vm288_vm2, %v1596_v26, 0 }
 0xc76   :  { %2440 = vmatmul.mubr.msk.bf16.vlgmr.msra.gmra.mxu0 %vm288_vm2, %v1344_v23 }
 0xc77   :  { %2450 = vmatpush3.bf16.xpose.msra.mxu0 %v1476_v41  ;;  %2451 = vmatprep.mubr.msk.bf16.mxu0 %vm2885_vm1, %v2884_v15 }
 0xc78   :  { %2461 = vmatprep.subr.bf16.mxu0 %v2884_v15 }
 0xc7e   :  { %2452 = vmatmul.mubr.msk.bf16.vlgmr.msra.gmra.mxu0 %vm288_vm2, %v1469_v27 }
 0xc7f   :  { %2462 = vmatpush3.bf16.xpose.msra.mxu0 %v1601_v28  ;;  %2463 = vmatprep.mubr.msk.bf16.mxu0 %vm2885_vm1, %v2884_v15 }
 0xc80   :  { %2473 = vmatprep.subr.bf16.mxu0 %v2884_v15 }
 0xc86   :  { %2464 = vmatmul.mubr.msk.bf16.vlgmr.msra.gmra.mxu0 %vm288_vm2, %v1594_v29 }
 0xc87   :  { %2477 = vmatprep.mubr.msk.bf16.mxu0 %vm2885_vm1, %v2884_v15 }
 0xd2e   :  { %v1262_v30 = vpop.f32.mrf.mxu0 }
 0xd2f   :  { %v1269_v33 = vmul.f32 0.35355338, %v1262_v30 }
 0xd30   :  { %v2429_v34 = vpop.f32.mrf.mxu0 }
 0xd31   :  { %v1271_v35 = vadd.f32 %v1269_v33, %v3100_v54 }
 0xd32   :  { %v1265_v36 = vpop.f32.mrf.mxu0 }
 0xd33   :  { %v1270_v37 = vmul.f32 0.35355338, %v1265_v36  ;;  %v1273_v38 = vsel %vm340_vm3, %v1271_v35, -inf }
 0xd34   :  { %1274 = vmax.xlane.f32.xlu1 %v1273_v38  ;;  %v2430_v39 = vpop.f32.mrf.mxu0 }
 0xd35   :  { %v1272_v40 = vadd.f32 %v1270_v37, %v3103_v59 }
 0xd36   :  { %v1387_v42 = vpop.f32.mrf.mxu0 }
 0xd37   :  { %v1394_v43 = vmul.f32 0.35355338, %v1387_v42  ;;  %v1276_v31 = vsel %vm340_vm3, %v1272_v40, -inf }
 0xd38   :  { %1277 = vmax.xlane.f32.xlu0 %v1276_v31  ;;  %v2441_v44 = vpop.f32.mrf.mxu0 }
 0xd39   :  { %v1396_v45 = vadd.f32 %v1394_v43, %v3100_v54 }
 0xd3a   :  { %v1390_v32 = vpop.f32.mrf.mxu0 }
 0xd3b   :  { %v1395_v46 = vmul.f32 0.35355338, %v1390_v32  ;;  %v1398_v47 = vsel %vm340_vm3, %v1396_v45, -inf }
 0xd3c   :  { %1399 = vmax.xlane.f32.xlu0 %v1398_v47  ;;  %v2442_v48 = vpop.f32.mrf.mxu0 }
 0xd3d   :  { %v1397_v49 = vadd.f32 %v1395_v46, %v3103_v59 }
 0xd3e   :  { %v1512_v50 = vpop.f32.mrf.mxu0 }
 0xd3f   :  { %v1519_v51 = vmul.f32 0.35355338, %v1512_v50  ;;  %v1401_v52 = vsel %vm340_vm3, %v1397_v49, -inf }
 0xd40   :  { %1402 = vmax.xlane.f32.xlu0 %v1401_v52  ;;  %v2453_v53 = vpop.f32.mrf.mxu0 }
 0xd41   :  { %v1521_v55 = vadd.f32 %v1519_v51, %v3100_v54 }
 0xd42   :  { %v1515_v56 = vpop.f32.mrf.mxu0 }
 0xd43   :  { %v1520_v57 = vmul.f32 0.35355338, %v1515_v56  ;;  %v1523_v58 = vsel %vm340_vm3, %v1521_v55, -inf }
 0xd44   :  { %1524 = vmax.xlane.f32.xlu1 %v1523_v58  ;;  %v2454_v60 = vpop.f32.mrf.mxu0 }
 0xd45   :  { %v1522_v61 = vadd.f32 %v1520_v57, %v3103_v59 }
 0xd46   :  { %v1637_v62 = vpop.f32.mrf.mxu0 }
 0xd47   :  { %v1644_v63 = vmul.f32 0.35355338, %v1637_v62  ;;  %v1526_v0 = vsel %vm340_vm3, %v1522_v61, -inf }
 0xd48   :  { %1527 = vmax.xlane.f32.xlu0 %v1526_v0  ;;  %v2465_v1 = vpop.f32.mrf.mxu0 }
 0xd49   :  { %v1646_v2 = vadd.f32 %v1644_v63, %v3100_v54 }
 0xd4a   :  { %v1640_v3 = vpop.f32.mrf.mxu0 }
 0xd4b   :  { %v1645_v4 = vmul.f32 0.35355338, %v1640_v3  ;;  %v1648_v5 = vsel %vm340_vm3, %v1646_v2, -inf }
 0xd4c   :  { %1649 = vmax.xlane.f32.xlu1 %v1648_v5  ;;  %v2466_v6 = vpop.f32.mrf.mxu0 }
 0xd4d   :  { %v1647_v7 = vadd.f32 %v1645_v4, %v3103_v59 }
 0xd4f   :  { %v1651_v10 = vsel %vm340_vm3, %v1647_v7, -inf }
 0xd50   :  { %1652 = vmax.xlane.f32.xlu0 %v1651_v10 }
 0xd5d   :  { %1296 = vrot.lane.b32.xlu1 %v3241_v19, %s2893_s29 }
 0xdbd   :  { %v1275_v11 = vpop.xlane.xlu1 %1274 }
 0xdbe   :  { %v1279_v12 = vsub.f32 %v1271_v35, %v1275_v11 }
 0xdc0   :  { %v1281_v13 = vmul.f32 1.442695, %v1279_v12 }
 0xdc1   :  { %v1278_v14 = vpop.xlane.xlu0 %1277 }
 0xdc2   :  { %2636 = vpow2.f32 %v1281_v13  ;;  %v1280_v54 = vsub.f32 %v1272_v40, %v1278_v14 }
 0xdc4   :  { %v1283_v16 = vmul.f32 1.442695, %v1280_v54 }
 0xdc5   :  { %v1400_v17 = vpop.xlane.xlu0 %1399 }
 0xdc6   :  { %2638 = vpow2.f32 %v1283_v16  ;;  %v1404_v18 = vsub.f32 %v1396_v45, %v1400_v17 }
 0xdc8   :  { %v1406_v20 = vmul.f32 1.442695, %v1404_v18 }
 0xdc9   :  { %v1403_v21 = vpop.xlane.xlu0 %1402 }
 0xdca   :  { %2640 = vpow2.f32 %v1406_v20  ;;  %v1405_v59 = vsub.f32 %v1397_v49, %v1403_v21 }
 0xdcc   :  { %v1408_v22 = vmul.f32 1.442695, %v1405_v59 }
 0xdcd   :  { %v1525_v23 = vpop.xlane.xlu1 %1524 }
 0xdce   :  { %2642 = vpow2.f32 %v1408_v22  ;;  %v1529_v24 = vsub.f32 %v1521_v55, %v1525_v23 }
 0xdcf   :  { %v2637_v25 = vpop.eup %2636 }
 0xdd0   :  { %v1531_v41 = vmul.f32 1.442695, %v1529_v24  ;;  %v1285_v26 = vsel %vm340_vm3, %v2637_v25, 0.0 }
 0xdd1   :  { %v1528_v27 = vpop.xlane.xlu0 %1527  ;;  %1286 = vadd.xlane.f32.xlu1 %v1285_v26 }
 0xdd2   :  { %2644 = vpow2.f32 %v1531_v41  ;;  %v1530_v28 = vsub.f32 %v1522_v61, %v1528_v27 }
 0xdd3   :  { %v2639_v29 = vpop.eup %2638 }
 0xdd4   :  { %v1533_v30 = vmul.f32 1.442695, %v1530_v28  ;;  %v1288_v33 = vsel %vm340_vm3, %v2639_v29, 0.0  ;;  %v2578_v28 = vld [vmem:[%s3415_s6 + $0x18] sm:$0xff]  }
 0xdd5   :  { %v1650_v34 = vpop.xlane.xlu1 %1649  ;;  %1289 = vadd.xlane.f32.xlu0 %v1288_v33  ;;  %2474 = vmatpush3.bf16.msra.mxu0 %v2578_v28 }
 0xdd6   :  { %2646 = vpow2.f32 %v1533_v30  ;;  %v1654_v35 = vsub.f32 %v1646_v2, %v1650_v34  ;;  %2475 = vmatprep.subr.bf16.mxu0 %v2884_v15 }
 0xdd7   :  { %v2641_v36 = vpop.eup %2640 }
 0xdd8   :  { %v1656_v37 = vmul.f32 1.442695, %v1654_v35  ;;  %v1410_v38 = vsel %vm340_vm3, %v2641_v36, 0.0  ;;  %v2579_v35 = vld [vmem:[%s3415_s6 + $0x10] sm:$0xff]  }
 0xdd9   :  { %1411 = vadd.xlane.f32.xlu1 %v1410_v38  ;;  %v1297_v39 = vpop.permute.xlu1 %1296  ;;  %v1653_v40 = vpop.xlane.xlu0 %1652  ;;  %2476 = vmatpush3.bf16.msra.mxu0 %v2579_v35 }
 0xdda   :  { %2648 = vpow2.f32 %v1656_v37  ;;  %v1655_v42 = vsub.f32 %v1647_v7, %v1653_v40  ;;  %2432 = vmatpush3.bf16.msra.mxu1 %v1297_v39  ;;  %2489 = vmatprep.subr.bf16.mxu0 %v2884_v15 }
 0xddb   :  { %v2643_v43 = vpop.eup %2642  ;;  %2443 = vmatprep.subr.bf16.mxu1 %v2884_v15 }
 0xddc   :  { %v1658_v31 = vmul.f32 1.442695, %v1655_v42  ;;  %v1413_v44 = vsel %vm340_vm3, %v2643_v43, 0.0 }
 0xddd   :  { %1414 = vadd.xlane.f32.xlu0 %v1413_v44 }
 0xdde   :  { %2650 = vpow2.f32 %v1658_v31 }
 0xddf   :  { %v2645_v45 = vpop.eup %2644 }
 0xde0   :  { %v1535_v32 = vsel %vm340_vm3, %v2645_v45, 0.0 }
 0xde1   :  { %1536 = vadd.xlane.f32.xlu1 %v1535_v32 }
 0xde3   :  { %v2647_v46 = vpop.eup %2646 }
 0xde4   :  { %v1538_v47 = vsel %vm340_vm3, %v2647_v46, 0.0 }
 0xde5   :  { %1539 = vadd.xlane.f32.xlu0 %v1538_v47 }
 0xde7   :  { %v2649_v48 = vpop.eup %2648 }
 0xde8   :  { %v1660_v49 = vsel %vm340_vm3, %v2649_v48, 0.0 }
 0xde9   :  { %1661 = vadd.xlane.f32.xlu1 %v1660_v49 }
 0xdeb   :  { %v2651_v50 = vpop.eup %2650 }
 0xdec   :  { %v1663_v51 = vsel %vm340_vm3, %v2651_v50, 0.0 }
 0xded   :  { %1664 = vadd.xlane.f32.xlu0 %v1663_v51 }
 0xdfa   :  { %1546 = vrot.lane.b32.xlu1 %v3241_v19, %s2894_s26 }
 0xdfe   :  { %1671 = vrot.lane.b32.xlu1 %v3241_v19, %s2895_s7 }
 0xe03   :  { %1421 = vrot.lane.b32.xlu0 %v3241_v19, %s2896_s27 }
 0xe5a   :  { %v1287_v52 = vpop.xlane.xlu1 %1286 }
 0xe5b   :  { %2652 = vrcp.f32 %v1287_v52 }
 0xe5e   :  { %v1290_v53 = vpop.xlane.xlu0 %1289 }
 0xe5f   :  { %2654 = vrcp.f32 %v1290_v53 }
 0xe62   :  { %v1412_v56 = vpop.xlane.xlu1 %1411 }
 0xe66   :  { %v1415_v55 = vpop.xlane.xlu0 %1414 }
 0xe67   :  { %2656 = vrcp.f32 %v1415_v55 }
 0xe68   :  { %v2653_v57 = vpop.eup %2652  ;;  %2658 = vrcp.f32 %v1412_v56 }
 0xe69   :  { %v1293_v60 = vmul.f32 %v2653_v57, %v2637_v25 }
 0xe6a   :  { %v1537_v63 = vpop.xlane.xlu1 %1536 }
 0xe6c   :  { %v2655_v58 = vpop.eup %2654 }
 0xe6d   :  { %v1294_v61 = vmul.f32 %v2655_v58, %v2639_v29 }
 0xe6e   :  { %v1540_v62 = vpop.xlane.xlu0 %1539 }
 0xe6f   :  { %v1295_v0 = vpack.c.bf16 %v1294_v61, %v1293_v60  ;;  %2660 = vrcp.f32 %v1540_v62  ;;  %v2232_v61 = vld [vmem:[#allocation11 + $0x1] ss:$0 sm:$0xff] }
 0xe70   :  { %2662 = vrcp.f32 %v1537_v63 }
 0xe71   :  { %2434 = vmatmul.mubr.msk.bf16.vlgmr.msra.gmra.mxu1 %vm340_vm3, %v1295_v0 }
 0xe72   :  { %2445 = vmatprep.mubr.msk.bf16.mxu1 %vm2885_vm1, %v2884_v15  ;;  %v1662_v3 = vpop.xlane.xlu1 %1661 }
 0xe74   :  { %v2657_v19 = vpop.eup %2656 }
 0xe75   :  { %v2659_v2 = vpop.eup %2658  ;;  %v1419_v4 = vmul.f32 %v2657_v19, %v2643_v43 }
 0xe76   :  { %v1665_v1 = vpop.xlane.xlu0 %1664  ;;  %v1418_v6 = vmul.f32 %v2659_v2, %v2641_v36  ;;  %v1547_v11 = vpop.permute.xlu1 %1546 }
 0xe77   :  { %2664 = vrcp.f32 %v1665_v1 }
 0xe78   :  { %2666 = vrcp.f32 %v1662_v3  ;;  %v1420_v7 = vpack.c.bf16 %v1419_v4, %v1418_v6 }
 0xe7a   :  { %v1422_v5 = vpop.permute.xlu0 %1421  ;;  %v1672_v17 = vpop.permute.xlu1 %1671 }
 0xe7b   :  { %2444 = vmatpush3.bf16.msra.mxu1 %v1422_v5 }
 0xe7c   :  { %2455 = vmatprep.subr.bf16.mxu1 %v2884_v15  ;;  %v2661_v10 = vpop.eup %2660 }
 0xe7d   :  { %v2663_v12 = vpop.eup %2662  ;;  %v1544_v13 = vmul.f32 %v2661_v10, %v2647_v46 }
 0xe7e   :  { %2446 = vmatmul.mubr.msk.bf16.vlgmr.msra.gmra.mxu1 %vm340_vm3, %v1420_v7  ;;  %v1543_v14 = vmul.f32 %v2663_v12, %v2645_v45 }
 0xe7f   :  { %2456 = vmatpush3.bf16.msra.mxu1 %v1547_v11  ;;  %2457 = vmatprep.mubr.msk.bf16.mxu1 %vm2885_vm1, %v2884_v15 }
 0xe80   :  { %2467 = vmatprep.subr.bf16.mxu1 %v2884_v15  ;;  %v1545_v54 = vpack.c.bf16 %v1544_v13, %v1543_v14 }
 0xe84   :  { %v2665_v16 = vpop.eup %2664 }
 0xe85   :  { %v2667_v18 = vpop.eup %2666  ;;  %v1669_v20 = vmul.f32 %v2665_v16, %v2651_v50 }
 0xe86   :  { %2458 = vmatmul.mubr.msk.bf16.vlgmr.msra.gmra.mxu1 %vm340_vm3, %v1545_v54  ;;  %v1668_v21 = vmul.f32 %v2667_v18, %v2649_v48  ;;  %v2581_v18 = vld [vmem:[%s3419_s10 + $0x10] sm:$0xff]  }
 0xe87   :  { %2468 = vmatpush3.bf16.msra.mxu1 %v1672_v17  ;;  %2469 = vmatprep.mubr.msk.bf16.mxu1 %vm2885_vm1, %v2884_v15 }
 0xe88   :  { %2481 = vmatprep.subr.bf16.mxu1 %v2884_v15  ;;  %v1670_v59 = vpack.c.bf16 %v1669_v20, %v1668_v21 }
 0xe8e   :  { %2470 = vmatmul.mubr.msk.bf16.vlgmr.msra.gmra.mxu1 %vm340_vm3, %v1670_v59 }
 0xe8f   :  { %2485 = vmatprep.mubr.msk.bf16.mxu1 %vm2885_vm1, %v2884_v15 }
 0xf31   :  { %v1336_v22 = vpop.f32.mrf.mxu1 }
 0xf33   :  { %v2435_v23 = vpop.f32.mrf.mxu1 }
 0xf35   :  { %v1339_v24 = vpop.f32.mrf.mxu1 }
 0xf37   :  { %v2436_v25 = vpop.f32.mrf.mxu1 }
 0xf3e   :  { %v1461_v41 = vpop.f32.mrf.mxu1 }
 0xf40   :  { %v2447_v26 = vpop.f32.mrf.mxu1 }
 0xf41   :  { %v2236_v26 = vld [vmem:[#allocation13 + $0x1] ss:$0 sm:$0xff] }
 0xf42   :  { %v1464_v27 = vpop.f32.mrf.mxu1 }
 0xf43   :  { %v2551_v29 = vpack.i.bf16 %v1464_v27, %v1461_v41 }
 0xf44   :  { %v2448_v30 = vpop.f32.mrf.mxu1 }
 0xf45   :  { %2552 = vrot.lane.b32.xlu1 %v2551_v29, %s2875_s1  ;;  %s3435_s1 = smov 24   ;;  %v2237_v30 = vld [vmem:[#allocation14 + $0x1] ss:$0 sm:$0xff] }
 0xf46   :  { %v1586_v33 = vpop.f32.mrf.mxu1 }
 0xf48   :  { %v2459_v34 = vpop.f32.mrf.mxu1 }
 0xf4a   :  { %v1589_v36 = vpop.f32.mrf.mxu1 }
 0xf4b   :  { %v2556_v37 = vpack.i.bf16 %v1589_v36, %v1586_v33 }
 0xf4c   :  { %v2460_v38 = vpop.f32.mrf.mxu1 }
 0xf4d   :  { %2557 = vrot.lane.b32.xlu0 %v2556_v37, %s2878_s28  ;;  %v2582_v37 = vld [vmem:[%s3421_s12 + $0x38] sm:$0xff]   ;;  %v2583_v38 = vld [vmem:[%s3421_s12 + $0x30] sm:$0xff]  }
 0xf4e   :  { %v1711_v39 = vpop.f32.mrf.mxu1 }
 0xf50   :  { %v2471_v40 = vpop.f32.mrf.mxu1 }
 0xf51   :  { %v2585_v40 = vld [vmem:[%s3421_s12 + $0x20] sm:$0xff]  }
 0xf52   :  { %v1714_v42 = vpop.f32.mrf.mxu1 }
 0xf53   :  { %v2561_v43 = vpack.i.bf16 %v1714_v42, %v1711_v39  ;;  %v2584_v39 = vld [vmem:[%s3421_s12 + $0x28] sm:$0xff]   ;;  %v2243_v42 = vld [vmem:[%s3420_s11 + $0x1] ss:$0 sm:$0xff] }
 0xf54   :  { %v2472_v31 = vpop.f32.mrf.mxu1 }
 0xf55   :  { %2562 = vrot.lane.b32.xlu1 %v2561_v43, %s3435_s1 }
 0xfb7   :  { %v2553_v44 = vpop.permute.xlu1 %2552 }
 0xfb8   :  { %v2555_v32 = vunpack.i.h.bf16 %v2553_v44  ;;  %v2554_v46 = vunpack.i.l.bf16 %v2553_v44 }
 0xfba   :  { %v1743_v50 = vsel %vm288_vm2, %v1339_v24, %v2555_v32  ;;  %v1742_v51 = vsel %vm288_vm2, %v1336_v22, %v2554_v46 }
 0xfbf   :  { %v2558_v45 = vpop.permute.xlu0 %2557 }
 0xfc0   :  { %v2560_v47 = vunpack.i.h.bf16 %v2558_v45  ;;  %v2559_v48 = vunpack.i.l.bf16 %v2558_v45 }
 0xfc2   :  { %v1745_v55 = vsel %vm340_vm3, %v1743_v50, %v2560_v47  ;;  %v1744_v56 = vsel %vm340_vm3, %v1742_v51, %v2559_v48 }
 0xfc7   :  { %v2563_v49 = vpop.permute.xlu1 %2562 }
 0xfc8   :  { %v2565_v52 = vunpack.i.h.bf16 %v2563_v49  ;;  %v2564_v53 = vunpack.i.l.bf16 %v2563_v49 }
 0xfca   :  { %v1747_v57 = vsel %vm814_vm4, %v1745_v55, %v2565_v52  ;;  %v1746_v58 = vsel %vm814_vm4, %v1744_v56, %v2564_v53 }
 0xfcb   :  { %v1748_v60 = vpack.c.bf16 %v1747_v57, %v1746_v58 }
 0xfcd   :  { %2478 = vmatmul.mubr.msk.bf16.vlgmr.msra.gmra.mxu0 %vm172_vm0, %v1748_v60 }
 0xfce   :  { %2497 = vmatprep.mubr.msk.bf16.mxu0 %vm2885_vm1, %v2884_v15  ;;  %2490 = vmatpush3.bf16.msra.mxu0 %v2582_v37 }
 0xfcf   :  { %2491 = vmatprep.subr.bf16.mxu0 %v2884_v15 }
 0xfd2   :  { %2492 = vmatpush3.bf16.msra.mxu0 %v2583_v38 }
 0xfd3   :  { %2493 = vmatprep.subr.bf16.mxu0 %v2884_v15 }
 0xfd6   :  { %2494 = vmatpush3.bf16.msra.mxu0 %v2584_v39 }
 0xfd7   :  { %2495 = vmatprep.subr.bf16.mxu0 %v2884_v15 }
 0xfda   :  { %2496 = vmatpush3.bf16.msra.mxu0 %v2585_v40 }
0x108d   :  { %v1811_v62 = vpop.f32.mrf.mxu0 }
0x108e   :  { %v1812_v63 = vadd.f32 %v2232_v61, %v1811_v62 }
0x108f   :  { %v2479_v0 = vpop.f32.mrf.mxu0 }
0x1090   :  { %v1818_v19 = vadd.f32 %v1812_v63, %v3232_v8 }
0x1091   :  { %v1814_v1 = vpop.f32.mrf.mxu0 }
0x1092   :  { %v1815_v2 = vadd.f32 %v2232_v61, %v1814_v1  ;;  %v1824_v3 = vsel %vm172_vm0, %v1818_v19, 0.0 }
0x1093   :  { %1825 = vadd.xlane.f32.xlu0 %v1824_v3  ;;  %v2480_v4 = vpop.f32.mrf.mxu0  ;;  %v2256_v3 = vld [vmem:[%s3422_s13 + $0x1] ss:$0 sm:$0xff] }
0x1094   :  { %v1819_v5 = vadd.f32 %v1815_v2, %v3234_v9  ;;  %v2580_v9 = vld [vmem:[%s3419_s10 + $0x18] sm:$0xff]  }
0x1095   :  { %2482 = vmatpush3.bf16.msra.mxu1 %v2580_v9 }
0x1096   :  { %v1827_v6 = vsel %vm172_vm0, %v1819_v5, 0.0  ;;  %2483 = vmatprep.subr.bf16.mxu1 %v2884_v15 }
0x1097   :  { %1828 = vadd.xlane.f32.xlu1 %v1827_v6 }
0x1099   :  { %2484 = vmatpush3.bf16.msra.mxu1 %v2581_v18 }
0x109a   :  { %2501 = vmatprep.subr.bf16.mxu1 %v2884_v15 }
0x111c   :  { %v1826_v7 = vpop.xlane.xlu0 %1825 }
0x111d   :  { %v1830_v10 = vmul.f32 0.03125, %v1826_v7 }
0x111f   :  { %v1832_v11 = vsub.f32 %v1818_v19, %v1830_v10 }
0x1120   :  { %v1829_v12 = vpop.xlane.xlu1 %1828 }
0x1121   :  { %v1831_v13 = vmul.f32 0.03125, %v1829_v12  ;;  %v1834_v14 = vmul.f32 %v1832_v11, %v1832_v11 }
0x1123   :  { %v1833_v54 = vsub.f32 %v1819_v5, %v1831_v13  ;;  %v1836_v8 = vsel %vm172_vm0, %v1834_v14, 0.0 }
0x1124   :  { %1837 = vadd.xlane.f32.xlu0 %v1836_v8 }
0x1125   :  { %v1835_v16 = vmul.f32 %v1833_v54, %v1833_v54 }
0x1127   :  { %v1839_v17 = vsel %vm172_vm0, %v1835_v16, 0.0 }
0x1128   :  { %1840 = vadd.xlane.f32.xlu0 %v1839_v17 }
0x11ad   :  { %v1838_v20 = vpop.xlane.xlu0 %1837 }
0x11ae   :  { %v1842_v21 = vmul.f32 0.03125, %v1838_v20 }
0x11b0   :  { %v1844_v59 = vadd.f32 1e-12, %v1842_v21 }
0x11b1   :  { %v1841_v22 = vpop.xlane.xlu0 %1840 }
0x11b2   :  { %2668 = vrsqrt.f32 %v1844_v59  ;;  %v1843_v23 = vmul.f32 0.03125, %v1841_v22 }
0x11b4   :  { %v1845_v24 = vadd.f32 1e-12, %v1843_v23 }
0x11b6   :  { %2670 = vrsqrt.f32 %v1845_v24  ;;  %v2586_v24 = vld [vmem:[%s3425_s16 + $0x8] sm:$0xff]  }
0x11bf   :  { %v2669_v25 = vpop.eup %2668 }
0x11c0   :  { %v1848_v41 = vmul.f32 %v2669_v25, %v1832_v11  ;;  %v2587_v25 = vld [vmem:[%s3425_s16] sm:$0xff]  }
0x11c2   :  { %v1856_v29 = vmul.f32 %v2236_v26, %v1848_v41 }
0x11c3   :  { %v2671_v27 = vpop.eup %2670 }
0x11c4   :  { %v1849_v28 = vmul.f32 %v2671_v27, %v1833_v54  ;;  %v1864_v34 = vadd.f32 %v2237_v30, %v1856_v29 }
0x11c6   :  { %v1857_v33 = vmul.f32 %v2236_v26, %v1849_v28 }
0x11c8   :  { %v1865_v35 = vadd.f32 %v2237_v30, %v1857_v33 }
0x11ca   :  { %v1866_v36 = vpack.c.bf16 %v1865_v35, %v1864_v34 }
0x11cc   :  { %2486 = vmatmul.mubr.msk.bf16.vlgmr.msra.gmra.mxu1 %vm172_vm0, %v1866_v36  ;;  %v2264_v36 = vld [vmem:[%s3423_s14 + $0x1] ss:$0 sm:$0xff]  ;;  %s2898_s14 = smov [#allocation16]  }
0x11cd   :  { %2505 = vmatprep.mubr.msk.bf16.mxu1 %vm2885_vm1, %v2884_v15  ;;  %2502 = vmatpush3.bf16.msra.mxu1 %v2586_v24  ;;  %s2167_s1 = sshll.u32 %s2898_s14, 4  ;;  %s2168_s1 = int_to_ptr.vmem [resolvable:$true] %s2167_s1 }
0x11ce   :  { %2503 = vmatprep.subr.bf16.mxu1 %v2884_v15  ;;  %v2265_v15 = vld [vmem:[%s3424_s15 + $0x1] ss:$0 sm:$0xff]  ;;  %s2840_s15 = scalar_lea.vmem %s2168_s1, 32  ;;  %p2845_p13 = scmp.lt.s32.totalorder %s2168_s1, %s2168_s1 }
0x11cf   :  { %p2841_p12 = scmp.ne.s32.totalorder %s2168_s1, %s2840_s15  ;;  %p2846_p0 = scmp.lt.s32.totalorder %s2840_s15, %s2840_s15 }
0x11d1   :  { %2504 = vmatpush3.bf16.msra.mxu1 %v2587_v25  ;;  %p2847_p1 = por %p2846_p0, %p2845_p13 }
0x11d3   :  { %p2848_p2 = pnand %p2847_p1, %p2841_p12 }
0x128c   :  { %v1929_v43 = vpop.f32.mrf.mxu1 }
0x128d   :  { %v1930_v31 = vadd.f32 %v2243_v42, %v1929_v43 }
0x128e   :  { %v2487_v44 = vpop.f32.mrf.mxu1 }
0x128f   :  { %v1936_v45 = vmul.f32 %v1930_v31, %v1930_v31 }
0x1290   :  { %v1932_v32 = vpop.f32.mrf.mxu1 }
0x1291   :  { %v1938_v46 = vmul.f32 %v1936_v45, %v1930_v31  ;;  %v1933_v47 = vadd.f32 %v2243_v42, %v1932_v32  ;;  %v2266_v45 = vld [vmem:[%s3426_s17] ss:$0 sm:$0xff] }
0x1292   :  { %v2488_v48 = vpop.f32.mrf.mxu1 }
0x1293   :  { %v1940_v49 = vmul.f32 0.044715, %v1938_v46  ;;  %v1937_v50 = vmul.f32 %v1933_v47, %v1933_v47 }
0x1295   :  { %v1942_v51 = vadd.f32 %v1940_v49, %v1930_v31  ;;  %v1939_v52 = vmul.f32 %v1937_v50, %v1933_v47 }
0x1297   :  { %v1944_v53 = vmul.f32 0.7978846, %v1942_v51  ;;  %v1941_v55 = vmul.f32 0.044715, %v1939_v52 }
0x1299   :  { %2672 = vtanh.f32 %v1944_v53  ;;  %v1943_v56 = vadd.f32 %v1941_v55, %v1933_v47 }
0x129b   :  { %v1945_v57 = vmul.f32 0.7978846, %v1943_v56 }
0x129d   :  { %2674 = vtanh.f32 %v1945_v57 }
0x12a6   :  { %v2673_v58 = vpop.eup %2672 }
0x12a7   :  { %v1948_v60 = vadd.f32 1.0, %v2673_v58 }
0x12a9   :  { %v1950_v62 = vmul.f32 0.5, %v1948_v60 }
0x12aa   :  { %v2675_v61 = vpop.eup %2674 }
0x12ab   :  { %v1949_v63 = vadd.f32 1.0, %v2675_v61  ;;  %v1952_v19 = vmul.f32 %v1950_v62, %v1930_v31 }
0x12ad   :  { %v1951_v0 = vmul.f32 0.5, %v1949_v63 }
0x12af   :  { %v1953_v1 = vmul.f32 %v1951_v0, %v1933_v47 }
0x12b1   :  { %v1954_v2 = vpack.c.bf16 %v1953_v1, %v1952_v19 }
0x12b3   :  { %2498 = vmatmul.mubr.msk.bf16.vlgmr.msra.gmra.mxu0 %vm1057_vm5, %v1954_v2 }
0x1373   :  { %v2033_v4 = vpop.f32.mrf.mxu0 }
0x1374   :  { %v2034_v5 = vadd.f32 %v2256_v3, %v2033_v4 }
0x1375   :  { %v2499_v6 = vpop.f32.mrf.mxu0 }
0x1376   :  { %v2040_v7 = vadd.f32 %v2034_v5, %v1864_v34 }
0x1377   :  { %v2036_v10 = vpop.f32.mrf.mxu0 }
0x1378   :  { %v2037_v11 = vadd.f32 %v2256_v3, %v2036_v10  ;;  %v2046_v12 = vsel %vm172_vm0, %v2040_v7, 0.0 }
0x1379   :  { %2047 = vadd.xlane.f32.xlu1 %v2046_v12  ;;  %v2500_v13 = vpop.f32.mrf.mxu0 }
0x137a   :  { %v2041_v14 = vadd.f32 %v2037_v11, %v1865_v35 }
0x137c   :  { %v2049_v54 = vsel %vm172_vm0, %v2041_v14, 0.0 }
0x137d   :  { %2050 = vadd.xlane.f32.xlu0 %v2049_v54 }
0x1402   :  { %v2048_v8 = vpop.xlane.xlu1 %2047 }
0x1403   :  { %v2052_v16 = vmul.f32 0.03125, %v2048_v8 }
0x1405   :  { %v2054_v17 = vsub.f32 %v2040_v7, %v2052_v16 }
0x1406   :  { %v2051_v9 = vpop.xlane.xlu0 %2050 }
0x1407   :  { %v2053_v18 = vmul.f32 0.03125, %v2051_v9  ;;  %v2056_v20 = vmul.f32 %v2054_v17, %v2054_v17 }
0x1409   :  { %v2055_v21 = vsub.f32 %v2041_v14, %v2053_v18  ;;  %v2058_v59 = vsel %vm172_vm0, %v2056_v20, 0.0 }
0x140a   :  { %2059 = vadd.xlane.f32.xlu1 %v2058_v59 }
0x140b   :  { %v2057_v22 = vmul.f32 %v2055_v21, %v2055_v21 }
0x140d   :  { %v2061_v23 = vsel %vm172_vm0, %v2057_v22, 0.0 }
0x140e   :  { %2062 = vadd.xlane.f32.xlu0 %v2061_v23 }
0x1493   :  { %v2060_v41 = vpop.xlane.xlu1 %2059 }
0x1494   :  { %v2064_v26 = vmul.f32 0.03125, %v2060_v41 }
0x1496   :  { %v2066_v27 = vadd.f32 1e-12, %v2064_v26 }
0x1497   :  { %v2063_v28 = vpop.xlane.xlu0 %2062 }
0x1498   :  { %2676 = vrsqrt.f32 %v2066_v27  ;;  %v2065_v29 = vmul.f32 0.03125, %v2063_v28 }
0x149a   :  { %v2067_v30 = vadd.f32 1e-12, %v2065_v29 }
0x149c   :  { %2678 = vrsqrt.f32 %v2067_v30 }
0x14a5   :  { %v2677_v33 = vpop.eup %2676 }
0x14a6   :  { %v2070_v34 = vmul.f32 %v2677_v33, %v2054_v17 }
0x14a8   :  { %v2078_v38 = vmul.f32 %v2264_v36, %v2070_v34 }
0x14a9   :  { %v2679_v35 = vpop.eup %2678 }
0x14aa   :  { %v2071_v37 = vmul.f32 %v2679_v35, %v2055_v21  ;;  %v2086_v42 = vadd.f32 %v2265_v15, %v2078_v38 }
0x14ac   :  { %v2079_v39 = vmul.f32 %v2264_v36, %v2071_v37 }
0x14ae   :  { %v2087_v40 = vadd.f32 %v2265_v15, %v2079_v39 }
0x14b0   :  { %v2089_v43 = vrot.slane %v2087_v40, 7 }
0x14b2   :  { %v2092_v31 = vsel %vm2091_vm6, %v2086_v42, %v2089_v43 }
0x14b3   :  { %v2093_v44 = vpack.c.bf16 %v2092_v31, %v2092_v31 }
0x14b5   :  { %2506 = vmatmul.mubr.msk.bf16.vlgmr.msra.gmra.mxu1 %vm172_vm0, %v2093_v44 }
0x1575   :  { %v2154_v32 = vpop.f32.mrf.mxu1 }
0x1576   :  { %v2155_v46 = vadd.f32 %v2266_v45, %v2154_v32 }
0x1577   :  { %v2507_v47 = vpop.f32.mrf.mxu1 }
0x1578   :  { %2160 = vst [vmem:[#allocation16] sm:$0x3] %v2155_v46 }
0x1579   :  { %v2157_v48 = vpop.f32.mrf.mxu1 }
0x157a   :  { %2851 = shalt.err (!%p2848_p2)
}
0x157b   :  { %2170 = dma.vmem_to_hbm [thread:$0]  %s2168_s1, 32, %s3427_s18, [#allocation4]   ;;  %v2508_v49 = vpop.f32.mrf.mxu1 }
0x157c   :  { %2870 = dma.done.wait [#allocation4], 32  }
0x157d   :  { %2871 = vsyncadd [#allocation4], 4294967264 }
0x157e   :  { %2174 = vsyncpa [#allocation3], 1 }
0x157f   :  { %2175 = vsyncpa [#allocation6], 1 }
0x1580   :  { %2176 = vsyncpa [#allocation9], 1 }
0x1581   :  { %2177 = vsyncpa [#allocation12], 1 }
0x1582   :  { %2178 = vsyncpa [#allocation15], 1 }
0x1583   :  { %2179 = vsyncpa [#allocation4], 1 }

</bundles_post_ra>
